<compile_context>
chip_gen: v5e
topology: v5e:2x2
jax: 0.10.0
libtpu: 0.0.40
codegen_flags: <defaults>
</compile_context>

<pallas_src>
import functools

import jax
import jax.numpy as jnp
from jax.experimental import pallas as pl
from jax.experimental.pallas import tpu as pltpu


def _round_up(x, m):
    return (x + m - 1) // m * m


# --------------------------------------------------------------------------- #
# Pallas kernel: fused (BN+ReLU prologue) -> GEMM -> (bias + BN + ReLU epilogue)
#   A      : (K, TM)    bf16   (K = KH*KW*Cin, TM = lane-dense pixel tile)
#   B      : (Cout, K)  bf16   (full weight, resident)
#   out    : (Cout, TM) bf16   (f32 accumulation, single cast at the store)
# Per-channel vectors broadcast along the lane (M) axis.
# --------------------------------------------------------------------------- #
def _fused_gemm_kernel(flags, *refs):
    pre_affine, add_bias, post_affine, post_relu = flags
    refs = list(refs)
    o_ref = refs.pop()                      # output ref is last (no scratch)
    it = iter(refs)
    a_ref = next(it)                        # (K, TM)   bf16
    b_ref = next(it)                        # (Cout, K) bf16
    bias_ref = next(it) if add_bias else None     # (Cout, 1) f32
    prs_ref = next(it) if pre_affine else None    # (K, 1)    f32
    prh_ref = next(it) if pre_affine else None    # (K, 1)    f32
    pos_ref = next(it) if post_affine else None   # (Cout, 1) f32
    poh_ref = next(it) if post_affine else None   # (Cout, 1) f32

    a = a_ref[...]
    if pre_affine:
        # BN(scale,shift)+ReLU on the input channels (1x1-conv prologue),
        # computed in f32, single cast back to bf16 for the MXU.
        a = jnp.maximum(a.astype(jnp.float32) * prs_ref[...] + prh_ref[...], 0.0)
        a = a.astype(jnp.bfloat16)

    acc = jnp.dot(b_ref[...], a, preferred_element_type=jnp.float32)  # (Cout,TM)

    if add_bias:
        acc = acc + bias_ref[...]
    if post_affine:
        acc = acc * pos_ref[...] + poh_ref[...]
    if post_relu:
        acc = jnp.maximum(acc, 0.0)
    o_ref[...] = acc.astype(o_ref.dtype)


def _pick_tm(m):
    """Only split M when a block's work clears the per-grid-step overhead;
    at this model's shapes (M = 128..512, K <= 147, Cout <= 32) one block wins."""
    if m <= 512:
        return m
    if m % 512 == 0:
        return 512
    return 256


def fused_matmul(a, b, bias=None, pre_scale=None, pre_shift=None,
                 post_scale=None, post_shift=None, post_relu=False):
    """a: (K, M) bf16, b: (Cout, K) bf16 -> (Cout, M) bf16 with fused epilogue."""
    K, M = a.shape
    N = b.shape[0]
    add_bias = bias is not None
    pre_affine = pre_scale is not None
    post_affine = post_scale is not None

    TM = _pick_tm(M)
    Mp = _round_up(M, TM)
    if Mp != M:
        a = jnp.pad(a, ((0, 0), (0, Mp - M)))

    operands = [a, b]
    in_specs = [
        pl.BlockSpec((K, TM), lambda i: (0, i)),   # A tile (lane-dense)
        pl.BlockSpec((N, K), lambda i: (0, 0)),    # full weight, resident
    ]
    if add_bias:
        operands.append(bias.astype(jnp.float32).reshape(N, 1))
        in_specs.append(pl.BlockSpec((N, 1), lambda i: (0, 0)))
    if pre_affine:
        operands.append(pre_scale.astype(jnp.float32).reshape(K, 1))
        operands.append(pre_shift.astype(jnp.float32).reshape(K, 1))
        in_specs.append(pl.BlockSpec((K, 1), lambda i: (0, 0)))
        in_specs.append(pl.BlockSpec((K, 1), lambda i: (0, 0)))
    if post_affine:
        operands.append(post_scale.astype(jnp.float32).reshape(N, 1))
        operands.append(post_shift.astype(jnp.float32).reshape(N, 1))
        in_specs.append(pl.BlockSpec((N, 1), lambda i: (0, 0)))
        in_specs.append(pl.BlockSpec((N, 1), lambda i: (0, 0)))

    kernel = functools.partial(
        _fused_gemm_kernel, (pre_affine, add_bias, post_affine, post_relu))

    flops = 2 * Mp * K * N
    bytes_accessed = K * Mp * 2 + N * K * 2 + N * Mp * 2 + 2 * (K + N) * 4 + N * 4

    out = pl.pallas_call(
        kernel,
        out_shape=jax.ShapeDtypeStruct((N, Mp), jnp.bfloat16),
        grid=(Mp // TM,),
        in_specs=in_specs,
        out_specs=pl.BlockSpec((N, TM), lambda i: (0, i)),
        compiler_params=pltpu.CompilerParams(
            dimension_semantics=("parallel",)),
        cost_estimate=pl.CostEstimate(flops=flops, transcendentals=0,
                                      bytes_accessed=bytes_accessed),
    )(*operands)
    return out[:, :M] if Mp != M else out


# --------------------------------------------------------------------------- #
# Conv2d on channel-first activations: im2col (thin JAX glue) + fused GEMM
#   x: (Cin, N, H, W) bf16, w: (Cout, KH, KW, Cin) bf16
# --------------------------------------------------------------------------- #
def conv2d(x, w, bias=None, stride=1, padding=0,
           pre_scale=None, pre_shift=None,
           post_scale=None, post_shift=None, post_relu=False):
    Cin, N, H, W = x.shape
    Cout, KH, KW, _ = w.shape
    Ho = (H + 2 * padding - KH) // stride + 1
    Wo = (W + 2 * padding - KW) // stride + 1

    if KH == 1 and KW == 1 and stride == 1 and padding == 0:
        a = x.reshape(Cin, N * H * W)
    else:
        xp = jnp.pad(x, ((0, 0), (0, 0), (padding, padding), (padding, padding)))
        taps = []
        for kh in range(KH):
            for kw in range(KW):
                taps.append(
                    xp[:, :, kh:kh + stride * (Ho - 1) + 1:stride,
                             kw:kw + stride * (Wo - 1) + 1:stride])
        a = jnp.concatenate(taps, axis=0).reshape(KH * KW * Cin, N * Ho * Wo)

    b = w.reshape(Cout, KH * KW * Cin)
    out = fused_matmul(a, b, bias=bias,
                       pre_scale=pre_scale, pre_shift=pre_shift,
                       post_scale=post_scale, post_shift=post_shift,
                       post_relu=post_relu)
    return out.reshape(Cout, N, Ho, Wo)


def pixel_shuffle(x, r):
    """Channel-first equivalent of nn.PixelShuffle(r): channel c*r*r + i*r + j."""
    Cr2, N, H, W = x.shape
    C = Cr2 // (r * r)
    x = x.reshape(C, r, r, N, H, W)
    x = x.transpose(0, 3, 4, 1, 5, 2)
    return x.reshape(C, N, H * r, W * r)


# --------------------------------------------------------------------------- #
# Deterministic parameter construction (shapes from _RDN.__init__)
# --------------------------------------------------------------------------- #
class ParamGen:
    def __init__(self, key):
        self.key = key

    def _next(self):
        self.key, sub = jax.random.split(self.key)
        return sub

    def conv(self, kh, kw, cin, cout, bias=True):
        # GEMM-ready layout (Cout, KH, KW, Cin), pre-cast to bf16 once.
        w = 0.05 * jax.random.normal(self._next(), (cout, kh, kw, cin), jnp.float32)
        b = (0.05 * jax.random.normal(self._next(), (cout,), jnp.float32)
             if bias else None)
        return {"w": w.astype(jnp.bfloat16), "b": b}

    def bn(self, c):
        # eval-mode BN folded into per-channel scale/shift (f32)
        gamma = 1.0 + 0.1 * jax.random.normal(self._next(), (c,), jnp.float32)
        beta = 0.1 * jax.random.normal(self._next(), (c,), jnp.float32)
        running_mean = jnp.zeros((c,), jnp.float32)
        running_var = jnp.ones((c,), jnp.float32)
        eps = 1e-5
        scale = gamma / jnp.sqrt(running_var + eps)
        shift = beta - running_mean * scale
        return {"scale": scale, "shift": shift}


def init_rdn_params(key, scale_factor, num_init_features, growth_rate,
                    block_config, bn_size):
    pg = ParamGen(key)
    p = {}
    p["f0_conv"] = pg.conv(7, 7, 3, num_init_features)
    p["f0_bn"] = pg.bn(num_init_features)
    p["f1_conv"] = pg.conv(3, 3, num_init_features, num_init_features)
    p["f1_bn"] = pg.bn(num_init_features)

    p["rdbs"] = []
    num_features = num_init_features
    for num_layers in block_config:
        layers = []
        for i in range(num_layers):
            cin = num_features + i * growth_rate
            layers.append({
                "bn1": pg.bn(cin),
                "conv1": pg.conv(1, 1, cin, bn_size * growth_rate, bias=False),
                "bn2": pg.bn(bn_size * growth_rate),
                "conv2": pg.conv(3, 3, bn_size * growth_rate, growth_rate, bias=False),
            })
        conv0 = pg.conv(1, 1, num_features + growth_rate * num_layers, num_features)
        p["rdbs"].append({"layers": layers, "conv0": conv0})

    cat_features = num_init_features * len(block_config)
    p["f3_conv1"] = pg.conv(1, 1, cat_features, num_init_features)
    p["f3_conv2"] = pg.conv(3, 3, num_init_features, num_init_features)

    p["upscale"] = []
    if scale_factor in (2, 4):
        for _ in range(scale_factor // 2):
            p["upscale"].append(pg.conv(3, 3, num_init_features, num_init_features * 4))
    else:
        p["upscale"].append(
            pg.conv(3, 3, num_init_features, num_init_features * scale_factor ** 2))
    p["out_conv"] = pg.conv(3, 3, num_init_features, 3)
    return p


# --------------------------------------------------------------------------- #
# Forward pass (mirrors _DenseLayer / _RDB / _RDN.forward), channel-first bf16
# --------------------------------------------------------------------------- #
def dense_layer_forward(lp, x_list):
    x = jnp.concatenate(x_list, axis=0) if len(x_list) > 1 else x_list[0]
    # norm1+relu (prologue) -> conv1 (1x1, no bias) -> norm2+relu (epilogue):
    # ONE Pallas kernel.
    x = conv2d(x, lp["conv1"]["w"], bias=None,
               pre_scale=lp["bn1"]["scale"], pre_shift=lp["bn1"]["shift"],
               post_scale=lp["bn2"]["scale"], post_shift=lp["bn2"]["shift"],
               post_relu=True)
    # conv2 (3x3, pad=1, no bias) on the already-activated tensor.
    x = conv2d(x, lp["conv2"]["w"], bias=None, stride=1, padding=1)
    # drop_rate == 0 -> dropout branch never taken in the reference module
    return x


def rdb_forward(rp, x):
    x_skip = x
    x_list = [x]
    for lp in rp["layers"]:
        x_list.append(dense_layer_forward(lp, x_list))
    x_cat = jnp.concatenate(x_list, axis=0)
    x_cat = conv2d(x_cat, rp["conv0"]["w"], rp["conv0"]["b"])
    return x_cat + x_skip


def rdn_forward(params, x_nchw, scale_factor):
    # channel-first (C, N, H, W) bf16 activations throughout
    x = jnp.transpose(x_nchw, (1, 0, 2, 3)).astype(jnp.bfloat16)

    # features0: conv(7x7,s2,p3) + BN + ReLU fused in one kernel
    f0 = conv2d(x, params["f0_conv"]["w"], params["f0_conv"]["b"],
                stride=2, padding=3,
                post_scale=params["f0_bn"]["scale"],
                post_shift=params["f0_bn"]["shift"], post_relu=True)
    # features1: conv(3x3,p1) + BN + ReLU fused
    f1 = conv2d(f0, params["f1_conv"]["w"], params["f1_conv"]["b"],
                stride=1, padding=1,
                post_scale=params["f1_bn"]["scale"],
                post_shift=params["f1_bn"]["shift"], post_relu=True)

    feat = f1
    feats = []
    for rp in params["rdbs"]:
        feat = rdb_forward(rp, feat)
        feats.append(feat)
    f2 = jnp.concatenate(feats, axis=0)

    f3 = conv2d(f2, params["f3_conv1"]["w"], params["f3_conv1"]["b"])
    f3 = conv2d(f3, params["f3_conv2"]["w"], params["f3_conv2"]["b"],
                stride=1, padding=1)

    f4 = f3
    r = 2 if scale_factor in (2, 4) else scale_factor
    for up in params["upscale"]:
        f4 = conv2d(f4, up["w"], up["b"], stride=1, padding=1)
        f4 = pixel_shuffle(f4, r)

    f5 = conv2d(f4, params["out_conv"]["w"], params["out_conv"]["b"],
                stride=1, padding=1)
    # back to NCHW f32 at the network boundary only
    return jnp.transpose(f5, (1, 0, 2, 3)).astype(jnp.float32)


if __name__ == "__main__":
    key = jax.random.PRNGKey(0)
    k_param, k_x = jax.random.split(key)

    # small, module-consistent configuration
    scale_factor = 2
    num_init_features = 8
    growth_rate = 4
    block_config = (2, 2)
    bn_size = 2
    # drop_rate = 0.0 -> dropout is a no-op in the reference module

    params = init_rdn_params(k_param, scale_factor, num_init_features,
                             growth_rate, block_config, bn_size)

    # PyTorch-equivalent NCHW input
    x = jax.random.normal(k_x, (2, 3, 16, 16), jnp.float32)

    fwd = jax.jit(functools.partial(rdn_forward, scale_factor=scale_factor))
    out = fwd(params, x)
    out = jax.block_until_ready(out)

    # features0 stride-2 halves 16->8, upscale x2 brings it back to 16, 3 channels
    assert out.shape == (2, 3, 16, 16), out.shape
    assert bool(jnp.all(jnp.isfinite(out)))
    print("KERNEL_OK")
</pallas_src>

<mosaic_0001>
module attributes {stable_mosaic.version = 11 : i64} {
  func.func @_fused_gemm_kernel(%arg0: i32, %arg1: memref<147x128xbf16, #tpu.memory_space<vmem>>, %arg2: memref<8x147xbf16, #tpu.memory_space<vmem>>, %arg3: memref<8x1xf32, #tpu.memory_space<vmem>>, %arg4: memref<8x1xf32, #tpu.memory_space<vmem>>, %arg5: memref<8x1xf32, #tpu.memory_space<vmem>>, %arg6: memref<8x128xbf16, #tpu.memory_space<vmem>>) attributes {dimension_semantics = [#tpu.dimension_semantics<parallel>], iteration_bounds = array<i64: 1>, scalar_prefetch = 0 : i64, scratch_operands = 0 : i64, tpu.core_type = #tpu.core_type<tc>, window_params = [{transform_indices = @transform_0, window_bounds = array<i64: 147, 128>}, {pipeline_mode = #tpu.pipeline_mode<synchronous>, transform_indices = @transform_1, window_bounds = array<i64: 8, 147>}, {pipeline_mode = #tpu.pipeline_mode<synchronous>, transform_indices = @transform_2, window_bounds = array<i64: 8, 1>}, {pipeline_mode = #tpu.pipeline_mode<synchronous>, transform_indices = @transform_3, window_bounds = array<i64: 8, 1>}, {pipeline_mode = #tpu.pipeline_mode<synchronous>, transform_indices = @transform_4, window_bounds = array<i64: 8, 1>}, {transform_indices = @transform_5, window_bounds = array<i64: 8, 128>}]} {
    %c0 = arith.constant 0 : index
    %c0_0 = arith.constant 0 : index
    %0 = vector.load %arg1[%c0, %c0_0] : memref<147x128xbf16, #tpu.memory_space<vmem>>, vector<147x128xbf16>
    %c0_1 = arith.constant 0 : index
    %c0_2 = arith.constant 0 : index
    %1 = vector.load %arg2[%c0_1, %c0_2] : memref<8x147xbf16, #tpu.memory_space<vmem>>, vector<8x147xbf16>
    %cst = arith.constant dense<0.000000e+00> : vector<8x128xf32>
    %2 = tpu.matmul %1, %0, %cst {dimension_numbers = #tpu.dot_dimension_numbers<[1], [0], [0], [1], [0, 0, 1, 1], [], []>} : vector<8x147xbf16>, vector<147x128xbf16>, vector<8x128xf32> -> vector<8x128xf32>
    %c0_3 = arith.constant 0 : index
    %c0_4 = arith.constant 0 : index
    %3 = vector.load %arg3[%c0_3, %c0_4] : memref<8x1xf32, #tpu.memory_space<vmem>>, vector<8x1xf32>
    %4 = vector.broadcast %3 : vector<8x1xf32> to vector<8x128xf32>
    %5 = arith.addf %2, %4 : vector<8x128xf32>
    %c0_5 = arith.constant 0 : index
    %c0_6 = arith.constant 0 : index
    %6 = vector.load %arg4[%c0_5, %c0_6] : memref<8x1xf32, #tpu.memory_space<vmem>>, vector<8x1xf32>
    %7 = vector.broadcast %6 : vector<8x1xf32> to vector<8x128xf32>
    %8 = arith.mulf %5, %7 : vector<8x128xf32>
    %c0_7 = arith.constant 0 : index
    %c0_8 = arith.constant 0 : index
    %9 = vector.load %arg5[%c0_7, %c0_8] : memref<8x1xf32, #tpu.memory_space<vmem>>, vector<8x1xf32>
    %10 = vector.broadcast %9 : vector<8x1xf32> to vector<8x128xf32>
    %11 = arith.addf %8, %10 : vector<8x128xf32>
    %cst_9 = arith.constant 0.000000e+00 : f32
    %12 = vector.broadcast %cst_9 : f32 to vector<8x128xf32>
    %13 = arith.maximumf %11, %12 : vector<8x128xf32>
    %14 = arith.truncf %13 : vector<8x128xf32> to vector<8x128xbf16>
    %c0_10 = arith.constant 0 : index
    %c0_11 = arith.constant 0 : index
    %15 = vector.load %arg6[%c0_10, %c0_11] : memref<8x128xbf16, #tpu.memory_space<vmem>>, vector<8x128xbf16>
    tpu.vector_store %arg6[%c0_10, %c0_11], %14 {strides = array<i32>} : memref<8x128xbf16, #tpu.memory_space<vmem>>, vector<8x128xbf16>,
    return
  }
  func.func @transform_0(%arg0: i32) -> (i32, i32) {
    %c0_i32 = arith.constant 0 : i32
    %c0_i32_0 = arith.constant 0 : i32
    return %c0_i32, %arg0 : i32, i32
  }
  func.func @transform_1(%arg0: i32) -> (i32, i32) {
    %c0_i32 = arith.constant 0 : i32
    %c0_i32_0 = arith.constant 0 : i32
    %c0_i32_1 = arith.constant 0 : i32
    return %c0_i32, %c0_i32_0 : i32, i32
  }
  func.func @transform_2(%arg0: i32) -> (i32, i32) {
    %c0_i32 = arith.constant 0 : i32
    %c0_i32_0 = arith.constant 0 : i32
    %c0_i32_1 = arith.constant 0 : i32
    return %c0_i32, %c0_i32_0 : i32, i32
  }
  func.func @transform_3(%arg0: i32) -> (i32, i32) {
    %c0_i32 = arith.constant 0 : i32
    %c0_i32_0 = arith.constant 0 : i32
    %c0_i32_1 = arith.constant 0 : i32
    return %c0_i32, %c0_i32_0 : i32, i32
  }
  func.func @transform_4(%arg0: i32) -> (i32, i32) {
    %c0_i32 = arith.constant 0 : i32
    %c0_i32_0 = arith.constant 0 : i32
    %c0_i32_1 = arith.constant 0 : i32
    return %c0_i32, %c0_i32_0 : i32, i32
  }
  func.func @transform_5(%arg0: i32) -> (i32, i32) {
    %c0_i32 = arith.constant 0 : i32
    %c0_i32_0 = arith.constant 0 : i32
    return %c0_i32, %arg0 : i32, i32
  }
}

module attributes {stable_mosaic.version = 11 : i64} {
  func.func @_fused_gemm_kernel(%arg0: i32, %arg1: memref<72x128xbf16, #tpu.memory_space<vmem>>, %arg2: memref<8x72xbf16, #tpu.memory_space<vmem>>, %arg3: memref<8x1xf32, #tpu.memory_space<vmem>>, %arg4: memref<8x1xf32, #tpu.memory_space<vmem>>, %arg5: memref<8x1xf32, #tpu.memory_space<vmem>>, %arg6: memref<8x128xbf16, #tpu.memory_space<vmem>>) attributes {dimension_semantics = [#tpu.dimension_semantics<parallel>], iteration_bounds = array<i64: 1>, scalar_prefetch = 0 : i64, scratch_operands = 0 : i64, tpu.core_type = #tpu.core_type<tc>, window_params = [{transform_indices = @transform_0, window_bounds = array<i64: 72, 128>}, {pipeline_mode = #tpu.pipeline_mode<synchronous>, transform_indices = @transform_1, window_bounds = array<i64: 8, 72>}, {pipeline_mode = #tpu.pipeline_mode<synchronous>, transform_indices = @transform_2, window_bounds = array<i64: 8, 1>}, {pipeline_mode = #tpu.pipeline_mode<synchronous>, transform_indices = @transform_3, window_bounds = array<i64: 8, 1>}, {pipeline_mode = #tpu.pipeline_mode<synchronous>, transform_indices = @transform_4, window_bounds = array<i64: 8, 1>}, {transform_indices = @transform_5, window_bounds = array<i64: 8, 128>}]} {
    %c0 = arith.constant 0 : index
    %c0_0 = arith.constant 0 : index
    %0 = vector.load %arg1[%c0, %c0_0] : memref<72x128xbf16, #tpu.memory_space<vmem>>, vector<72x128xbf16>
    %c0_1 = arith.constant 0 : index
    %c0_2 = arith.constant 0 : index
    %1 = vector.load %arg2[%c0_1, %c0_2] : memref<8x72xbf16, #tpu.memory_space<vmem>>, vector<8x72xbf16>
    %cst = arith.constant dense<0.000000e+00> : vector<8x128xf32>
    %2 = tpu.matmul %1, %0, %cst {dimension_numbers = #tpu.dot_dimension_numbers<[1], [0], [0], [1], [0, 0, 1, 1], [], []>} : vector<8x72xbf16>, vector<72x128xbf16>, vector<8x128xf32> -> vector<8x128xf32>
    %c0_3 = arith.constant 0 : index
    %c0_4 = arith.constant 0 : index
    %3 = vector.load %arg3[%c0_3, %c0_4] : memref<8x1xf32, #tpu.memory_space<vmem>>, vector<8x1xf32>
    %4 = vector.broadcast %3 : vector<8x1xf32> to vector<8x128xf32>
    %5 = arith.addf %2, %4 : vector<8x128xf32>
    %c0_5 = arith.constant 0 : index
    %c0_6 = arith.constant 0 : index
    %6 = vector.load %arg4[%c0_5, %c0_6] : memref<8x1xf32, #tpu.memory_space<vmem>>, vector<8x1xf32>
    %7 = vector.broadcast %6 : vector<8x1xf32> to vector<8x128xf32>
    %8 = arith.mulf %5, %7 : vector<8x128xf32>
    %c0_7 = arith.constant 0 : index
    %c0_8 = arith.constant 0 : index
    %9 = vector.load %arg5[%c0_7, %c0_8] : memref<8x1xf32, #tpu.memory_space<vmem>>, vector<8x1xf32>
    %10 = vector.broadcast %9 : vector<8x1xf32> to vector<8x128xf32>
    %11 = arith.addf %8, %10 : vector<8x128xf32>
    %cst_9 = arith.constant 0.000000e+00 : f32
    %12 = vector.broadcast %cst_9 : f32 to vector<8x128xf32>
    %13 = arith.maximumf %11, %12 : vector<8x128xf32>
    %14 = arith.truncf %13 : vector<8x128xf32> to vector<8x128xbf16>
    %c0_10 = arith.constant 0 : index
    %c0_11 = arith.constant 0 : index
    %15 = vector.load %arg6[%c0_10, %c0_11] : memref<8x128xbf16, #tpu.memory_space<vmem>>, vector<8x128xbf16>
    tpu.vector_store %arg6[%c0_10, %c0_11], %14 {strides = array<i32>} : memref<8x128xbf16, #tpu.memory_space<vmem>>, vector<8x128xbf16>,
    return
  }
  func.func @transform_0(%arg0: i32) -> (i32, i32) {
    %c0_i32 = arith.constant 0 : i32
    %c0_i32_0 = arith.constant 0 : i32
    return %c0_i32, %arg0 : i32, i32
  }
  func.func @transform_1(%arg0: i32) -> (i32, i32) {
    %c0_i32 = arith.constant 0 : i32
    %c0_i32_0 = arith.constant 0 : i32
    %c0_i32_1 = arith.constant 0 : i32
    return %c0_i32, %c0_i32_0 : i32, i32
  }
  func.func @transform_2(%arg0: i32) -> (i32, i32) {
    %c0_i32 = arith.constant 0 : i32
    %c0_i32_0 = arith.constant 0 : i32
    %c0_i32_1 = arith.constant 0 : i32
    return %c0_i32, %c0_i32_0 : i32, i32
  }
  func.func @transform_3(%arg0: i32) -> (i32, i32) {
    %c0_i32 = arith.constant 0 : i32
    %c0_i32_0 = arith.constant 0 : i32
    %c0_i32_1 = arith.constant 0 : i32
    return %c0_i32, %c0_i32_0 : i32, i32
  }
  func.func @transform_4(%arg0: i32) -> (i32, i32) {
    %c0_i32 = arith.constant 0 : i32
    %c0_i32_0 = arith.constant 0 : i32
    %c0_i32_1 = arith.constant 0 : i32
    return %c0_i32, %c0_i32_0 : i32, i32
  }
  func.func @transform_5(%arg0: i32) -> (i32, i32) {
    %c0_i32 = arith.constant 0 : i32
    %c0_i32_0 = arith.constant 0 : i32
    return %c0_i32, %arg0 : i32, i32
  }
}

module attributes {stable_mosaic.version = 11 : i64} {
  func.func @_fused_gemm_kernel(%arg0: i32, %arg1: memref<8x128xbf16, #tpu.memory_space<vmem>>, %arg2: memref<8x8xbf16, #tpu.memory_space<vmem>>, %arg3: memref<8x1xf32, #tpu.memory_space<vmem>>, %arg4: memref<8x1xf32, #tpu.memory_space<vmem>>, %arg5: memref<8x1xf32, #tpu.memory_space<vmem>>, %arg6: memref<8x1xf32, #tpu.memory_space<vmem>>, %arg7: memref<8x128xbf16, #tpu.memory_space<vmem>>) attributes {dimension_semantics = [#tpu.dimension_semantics<parallel>], iteration_bounds = array<i64: 1>, scalar_prefetch = 0 : i64, scratch_operands = 0 : i64, tpu.core_type = #tpu.core_type<tc>, window_params = [{transform_indices = @transform_0, window_bounds = array<i64: 8, 128>}, {pipeline_mode = #tpu.pipeline_mode<synchronous>, transform_indices = @transform_1, window_bounds = array<i64: 8, 8>}, {pipeline_mode = #tpu.pipeline_mode<synchronous>, transform_indices = @transform_2, window_bounds = array<i64: 8, 1>}, {pipeline_mode = #tpu.pipeline_mode<synchronous>, transform_indices = @transform_3, window_bounds = array<i64: 8, 1>}, {pipeline_mode = #tpu.pipeline_mode<synchronous>, transform_indices = @transform_4, window_bounds = array<i64: 8, 1>}, {pipeline_mode = #tpu.pipeline_mode<synchronous>, transform_indices = @transform_5, window_bounds = array<i64: 8, 1>}, {transform_indices = @transform_6, window_bounds = array<i64: 8, 128>}]} {
    %c0 = arith.constant 0 : index
    %c0_0 = arith.constant 0 : index
    %0 = vector.load %arg1[%c0, %c0_0] : memref<8x128xbf16, #tpu.memory_space<vmem>>, vector<8x128xbf16>
    %1 = arith.extf %0 : vector<8x128xbf16> to vector<8x128xf32>
    %c0_1 = arith.constant 0 : index
    %c0_2 = arith.constant 0 : index
    %2 = vector.load %arg3[%c0_1, %c0_2] : memref<8x1xf32, #tpu.memory_space<vmem>>, vector<8x1xf32>
    %3 = vector.broadcast %2 : vector<8x1xf32> to vector<8x128xf32>
    %4 = arith.mulf %1, %3 : vector<8x128xf32>
    %c0_3 = arith.constant 0 : index
    %c0_4 = arith.constant 0 : index
    %5 = vector.load %arg4[%c0_3, %c0_4] : memref<8x1xf32, #tpu.memory_space<vmem>>, vector<8x1xf32>
    %6 = vector.broadcast %5 : vector<8x1xf32> to vector<8x128xf32>
    %7 = arith.addf %4, %6 : vector<8x128xf32>
    %cst = arith.constant 0.000000e+00 : f32
    %8 = vector.broadcast %cst : f32 to vector<8x128xf32>
    %9 = arith.maximumf %7, %8 : vector<8x128xf32>
    %10 = arith.truncf %9 : vector<8x128xf32> to vector<8x128xbf16>
    %c0_5 = arith.constant 0 : index
    %c0_6 = arith.constant 0 : index
    %11 = vector.load %arg2[%c0_5, %c0_6] : memref<8x8xbf16, #tpu.memory_space<vmem>>, vector<8x8xbf16>
    %cst_7 = arith.constant dense<0.000000e+00> : vector<8x128xf32>
    %12 = tpu.matmul %11, %10, %cst_7 {dimension_numbers = #tpu.dot_dimension_numbers<[1], [0], [0], [1], [0, 0, 1, 1], [], []>} : vector<8x8xbf16>, vector<8x128xbf16>, vector<8x128xf32> -> vector<8x128xf32>
    %c0_8 = arith.constant 0 : index
    %c0_9 = arith.constant 0 : index
    %13 = vector.load %arg5[%c0_8, %c0_9] : memref<8x1xf32, #tpu.memory_space<vmem>>, vector<8x1xf32>
    %14 = vector.broadcast %13 : vector<8x1xf32> to vector<8x128xf32>
    %15 = arith.mulf %12, %14 : vector<8x128xf32>
    %c0_10 = arith.constant 0 : index
    %c0_11 = arith.constant 0 : index
    %16 = vector.load %arg6[%c0_10, %c0_11] : memref<8x1xf32, #tpu.memory_space<vmem>>, vector<8x1xf32>
    %17 = vector.broadcast %16 : vector<8x1xf32> to vector<8x128xf32>
    %18 = arith.addf %15, %17 : vector<8x128xf32>
    %cst_12 = arith.constant 0.000000e+00 : f32
    %19 = vector.broadcast %cst_12 : f32 to vector<8x128xf32>
    %20 = arith.maximumf %18, %19 : vector<8x128xf32>
    %21 = arith.truncf %20 : vector<8x128xf32> to vector<8x128xbf16>
    %c0_13 = arith.constant 0 : index
    %c0_14 = arith.constant 0 : index
    %22 = vector.load %arg7[%c0_13, %c0_14] : memref<8x128xbf16, #tpu.memory_space<vmem>>, vector<8x128xbf16>
    tpu.vector_store %arg7[%c0_13, %c0_14], %21 {strides = array<i32>} : memref<8x128xbf16, #tpu.memory_space<vmem>>, vector<8x128xbf16>,
    return
  }
  func.func @transform_0(%arg0: i32) -> (i32, i32) {
    %c0_i32 = arith.constant 0 : i32
    %c0_i32_0 = arith.constant 0 : i32
    return %c0_i32, %arg0 : i32, i32
  }
  func.func @transform_1(%arg0: i32) -> (i32, i32) {
    %c0_i32 = arith.constant 0 : i32
    %c0_i32_0 = arith.constant 0 : i32
    %c0_i32_1 = arith.constant 0 : i32
    return %c0_i32, %c0_i32_0 : i32, i32
  }
  func.func @transform_2(%arg0: i32) -> (i32, i32) {
    %c0_i32 = arith.constant 0 : i32
    %c0_i32_0 = arith.constant 0 : i32
    %c0_i32_1 = arith.constant 0 : i32
    return %c0_i32, %c0_i32_0 : i32, i32
  }
  func.func @transform_3(%arg0: i32) -> (i32, i32) {
    %c0_i32 = arith.constant 0 : i32
    %c0_i32_0 = arith.constant 0 : i32
    %c0_i32_1 = arith.constant 0 : i32
    return %c0_i32, %c0_i32_0 : i32, i32
  }
  func.func @transform_4(%arg0: i32) -> (i32, i32) {
    %c0_i32 = arith.constant 0 : i32
    %c0_i32_0 = arith.constant 0 : i32
    %c0_i32_1 = arith.constant 0 : i32
    return %c0_i32, %c0_i32_0 : i32, i32
  }
  func.func @transform_5(%arg0: i32) -> (i32, i32) {
    %c0_i32 = arith.constant 0 : i32
    %c0_i32_0 = arith.constant 0 : i32
    %c0_i32_1 = arith.constant 0 : i32
    return %c0_i32, %c0_i32_0 : i32, i32
  }
  func.func @transform_6(%arg0: i32) -> (i32, i32) {
    %c0_i32 = arith.constant 0 : i32
    %c0_i32_0 = arith.constant 0 : i32
    return %c0_i32, %arg0 : i32, i32
  }
}

module attributes {stable_mosaic.version = 11 : i64} {
  func.func @_fused_gemm_kernel(%arg0: i32, %arg1: memref<72x128xbf16, #tpu.memory_space<vmem>>, %arg2: memref<4x72xbf16, #tpu.memory_space<vmem>>, %arg3: memref<4x128xbf16, #tpu.memory_space<vmem>>) attributes {dimension_semantics = [#tpu.dimension_semantics<parallel>], iteration_bounds = array<i64: 1>, scalar_prefetch = 0 : i64, scratch_operands = 0 : i64, tpu.core_type = #tpu.core_type<tc>, window_params = [{transform_indices = @transform_0, window_bounds = array<i64: 72, 128>}, {pipeline_mode = #tpu.pipeline_mode<synchronous>, transform_indices = @transform_1, window_bounds = array<i64: 4, 72>}, {transform_indices = @transform_2, window_bounds = array<i64: 4, 128>}]} {
    %c0 = arith.constant 0 : index
    %c0_0 = arith.constant 0 : index
    %0 = vector.load %arg1[%c0, %c0_0] : memref<72x128xbf16, #tpu.memory_space<vmem>>, vector<72x128xbf16>
    %c0_1 = arith.constant 0 : index
    %c0_2 = arith.constant 0 : index
    %1 = vector.load %arg2[%c0_1, %c0_2] : memref<4x72xbf16, #tpu.memory_space<vmem>>, vector<4x72xbf16>
    %cst = arith.constant dense<0.000000e+00> : vector<4x128xf32>
    %2 = tpu.matmul %1, %0, %cst {dimension_numbers = #tpu.dot_dimension_numbers<[1], [0], [0], [1], [0, 0, 1, 1], [], []>} : vector<4x72xbf16>, vector<72x128xbf16>, vector<4x128xf32> -> vector<4x128xf32>
    %3 = arith.truncf %2 : vector<4x128xf32> to vector<4x128xbf16>
    %c0_3 = arith.constant 0 : index
    %c0_4 = arith.constant 0 : index
    %4 = vector.load %arg3[%c0_3, %c0_4] : memref<4x128xbf16, #tpu.memory_space<vmem>>, vector<4x128xbf16>
    tpu.vector_store %arg3[%c0_3, %c0_4], %3 {strides = array<i32>} : memref<4x128xbf16, #tpu.memory_space<vmem>>, vector<4x128xbf16>,
    return
  }
  func.func @transform_0(%arg0: i32) -> (i32, i32) {
    %c0_i32 = arith.constant 0 : i32
    %c0_i32_0 = arith.constant 0 : i32
    return %c0_i32, %arg0 : i32, i32
  }
  func.func @transform_1(%arg0: i32) -> (i32, i32) {
    %c0_i32 = arith.constant 0 : i32
    %c0_i32_0 = arith.constant 0 : i32
    %c0_i32_1 = arith.constant 0 : i32
    return %c0_i32, %c0_i32_0 : i32, i32
  }
  func.func @transform_2(%arg0: i32) -> (i32, i32) {
    %c0_i32 = arith.constant 0 : i32
    %c0_i32_0 = arith.constant 0 : i32
    return %c0_i32, %arg0 : i32, i32
  }
}

module attributes {stable_mosaic.version = 11 : i64} {
  func.func @_fused_gemm_kernel(%arg0: i32, %arg1: memref<16x128xbf16, #tpu.memory_space<vmem>>, %arg2: memref<8x16xbf16, #tpu.memory_space<vmem>>, %arg3: memref<8x1xf32, #tpu.memory_space<vmem>>, %arg4: memref<8x128xbf16, #tpu.memory_space<vmem>>) attributes {dimension_semantics = [#tpu.dimension_semantics<parallel>], iteration_bounds = array<i64: 1>, scalar_prefetch = 0 : i64, scratch_operands = 0 : i64, tpu.core_type = #tpu.core_type<tc>, window_params = [{transform_indices = @transform_0, window_bounds = array<i64: 16, 128>}, {pipeline_mode = #tpu.pipeline_mode<synchronous>, transform_indices = @transform_1, window_bounds = array<i64: 8, 16>}, {pipeline_mode = #tpu.pipeline_mode<synchronous>, transform_indices = @transform_2, window_bounds = array<i64: 8, 1>}, {transform_indices = @transform_3, window_bounds = array<i64: 8, 128>}]} {
    %c0 = arith.constant 0 : index
    %c0_0 = arith.constant 0 : index
    %0 = vector.load %arg1[%c0, %c0_0] : memref<16x128xbf16, #tpu.memory_space<vmem>>, vector<16x128xbf16>
    %c0_1 = arith.constant 0 : index
    %c0_2 = arith.constant 0 : index
    %1 = vector.load %arg2[%c0_1, %c0_2] : memref<8x16xbf16, #tpu.memory_space<vmem>>, vector<8x16xbf16>
    %cst = arith.constant dense<0.000000e+00> : vector<8x128xf32>
    %2 = tpu.matmul %1, %0, %cst {dimension_numbers = #tpu.dot_dimension_numbers<[1], [0], [0], [1], [0, 0, 1, 1], [], []>} : vector<8x16xbf16>, vector<16x128xbf16>, vector<8x128xf32> -> vector<8x128xf32>
    %c0_3 = arith.constant 0 : index
    %c0_4 = arith.constant 0 : index
    %3 = vector.load %arg3[%c0_3, %c0_4] : memref<8x1xf32, #tpu.memory_space<vmem>>, vector<8x1xf32>
    %4 = vector.broadcast %3 : vector<8x1xf32> to vector<8x128xf32>
    %5 = arith.addf %2, %4 : vector<8x128xf32>
    %6 = arith.truncf %5 : vector<8x128xf32> to vector<8x128xbf16>
    %c0_5 = arith.constant 0 : index
    %c0_6 = arith.constant 0 : index
    %7 = vector.load %arg4[%c0_5, %c0_6] : memref<8x128xbf16, #tpu.memory_space<vmem>>, vector<8x128xbf16>
    tpu.vector_store %arg4[%c0_5, %c0_6], %6 {strides = array<i32>} : memref<8x128xbf16, #tpu.memory_space<vmem>>, vector<8x128xbf16>,
    return
  }
  func.func @transform_0(%arg0: i32) -> (i32, i32) {
    %c0_i32 = arith.constant 0 : i32
    %c0_i32_0 = arith.constant 0 : i32
    return %c0_i32, %arg0 : i32, i32
  }
  func.func @transform_1(%arg0: i32) -> (i32, i32) {
    %c0_i32 = arith.constant 0 : i32
    %c0_i32_0 = arith.constant 0 : i32
    %c0_i32_1 = arith.constant 0 : i32
    return %c0_i32, %c0_i32_0 : i32, i32
  }
  func.func @transform_2(%arg0: i32) -> (i32, i32) {
    %c0_i32 = arith.constant 0 : i32
    %c0_i32_0 = arith.constant 0 : i32
    %c0_i32_1 = arith.constant 0 : i32
    return %c0_i32, %c0_i32_0 : i32, i32
  }
  func.func @transform_3(%arg0: i32) -> (i32, i32) {
    %c0_i32 = arith.constant 0 : i32
    %c0_i32_0 = arith.constant 0 : i32
    return %c0_i32, %arg0 : i32, i32
  }
}

module attributes {stable_mosaic.version = 11 : i64} {
  func.func @_fused_gemm_kernel(%arg0: i32, %arg1: memref<12x128xbf16, #tpu.memory_space<vmem>>, %arg2: memref<8x12xbf16, #tpu.memory_space<vmem>>, %arg3: memref<12x1xf32, #tpu.memory_space<vmem>>, %arg4: memref<12x1xf32, #tpu.memory_space<vmem>>, %arg5: memref<8x1xf32, #tpu.memory_space<vmem>>, %arg6: memref<8x1xf32, #tpu.memory_space<vmem>>, %arg7: memref<8x128xbf16, #tpu.memory_space<vmem>>) attributes {dimension_semantics = [#tpu.dimension_semantics<parallel>], iteration_bounds = array<i64: 1>, scalar_prefetch = 0 : i64, scratch_operands = 0 : i64, tpu.core_type = #tpu.core_type<tc>, window_params = [{transform_indices = @transform_0, window_bounds = array<i64: 12, 128>}, {pipeline_mode = #tpu.pipeline_mode<synchronous>, transform_indices = @transform_1, window_bounds = array<i64: 8, 12>}, {pipeline_mode = #tpu.pipeline_mode<synchronous>, transform_indices = @transform_2, window_bounds = array<i64: 12, 1>}, {pipeline_mode = #tpu.pipeline_mode<synchronous>, transform_indices = @transform_3, window_bounds = array<i64: 12, 1>}, {pipeline_mode = #tpu.pipeline_mode<synchronous>, transform_indices = @transform_4, window_bounds = array<i64: 8, 1>}, {pipeline_mode = #tpu.pipeline_mode<synchronous>, transform_indices = @transform_5, window_bounds = array<i64: 8, 1>}, {transform_indices = @transform_6, window_bounds = array<i64: 8, 128>}]} {
    %c0 = arith.constant 0 : index
    %c0_0 = arith.constant 0 : index
    %0 = vector.load %arg1[%c0, %c0_0] : memref<12x128xbf16, #tpu.memory_space<vmem>>, vector<12x128xbf16>
    %1 = arith.extf %0 : vector<12x128xbf16> to vector<12x128xf32>
    %c0_1 = arith.constant 0 : index
    %c0_2 = arith.constant 0 : index
    %2 = vector.load %arg3[%c0_1, %c0_2] : memref<12x1xf32, #tpu.memory_space<vmem>>, vector<12x1xf32>
    %3 = vector.broadcast %2 : vector<12x1xf32> to vector<12x128xf32>
    %4 = arith.mulf %1, %3 : vector<12x128xf32>
    %c0_3 = arith.constant 0 : index
    %c0_4 = arith.constant 0 : index
    %5 = vector.load %arg4[%c0_3, %c0_4] : memref<12x1xf32, #tpu.memory_space<vmem>>, vector<12x1xf32>
    %6 = vector.broadcast %5 : vector<12x1xf32> to vector<12x128xf32>
    %7 = arith.addf %4, %6 : vector<12x128xf32>
    %cst = arith.constant 0.000000e+00 : f32
    %8 = vector.broadcast %cst : f32 to vector<12x128xf32>
    %9 = arith.maximumf %7, %8 : vector<12x128xf32>
    %10 = arith.truncf %9 : vector<12x128xf32> to vector<12x128xbf16>
    %c0_5 = arith.constant 0 : index
    %c0_6 = arith.constant 0 : index
    %11 = vector.load %arg2[%c0_5, %c0_6] : memref<8x12xbf16, #tpu.memory_space<vmem>>, vector<8x12xbf16>
    %cst_7 = arith.constant dense<0.000000e+00> : vector<8x128xf32>
    %12 = tpu.matmul %11, %10, %cst_7 {dimension_numbers = #tpu.dot_dimension_numbers<[1], [0], [0], [1], [0, 0, 1, 1], [], []>} : vector<8x12xbf16>, vector<12x128xbf16>, vector<8x128xf32> -> vector<8x128xf32>
    %c0_8 = arith.constant 0 : index
    %c0_9 = arith.constant 0 : index
    %13 = vector.load %arg5[%c0_8, %c0_9] : memref<8x1xf32, #tpu.memory_space<vmem>>, vector<8x1xf32>
    %14 = vector.broadcast %13 : vector<8x1xf32> to vector<8x128xf32>
    %15 = arith.mulf %12, %14 : vector<8x128xf32>
    %c0_10 = arith.constant 0 : index
    %c0_11 = arith.constant 0 : index
    %16 = vector.load %arg6[%c0_10, %c0_11] : memref<8x1xf32, #tpu.memory_space<vmem>>, vector<8x1xf32>
    %17 = vector.broadcast %16 : vector<8x1xf32> to vector<8x128xf32>
    %18 = arith.addf %15, %17 : vector<8x128xf32>
    %cst_12 = arith.constant 0.000000e+00 : f32
    %19 = vector.broadcast %cst_12 : f32 to vector<8x128xf32>
    %20 = arith.maximumf %18, %19 : vector<8x128xf32>
    %21 = arith.truncf %20 : vector<8x128xf32> to vector<8x128xbf16>
    %c0_13 = arith.constant 0 : index
    %c0_14 = arith.constant 0 : index
    %22 = vector.load %arg7[%c0_13, %c0_14] : memref<8x128xbf16, #tpu.memory_space<vmem>>, vector<8x128xbf16>
    tpu.vector_store %arg7[%c0_13, %c0_14], %21 {strides = array<i32>} : memref<8x128xbf16, #tpu.memory_space<vmem>>, vector<8x128xbf16>,
    return
  }
  func.func @transform_0(%arg0: i32) -> (i32, i32) {
    %c0_i32 = arith.constant 0 : i32
    %c0_i32_0 = arith.constant 0 : i32
    return %c0_i32, %arg0 : i32, i32
  }
  func.func @transform_1(%arg0: i32) -> (i32, i32) {
    %c0_i32 = arith.constant 0 : i32
    %c0_i32_0 = arith.constant 0 : i32
    %c0_i32_1 = arith.constant 0 : i32
    return %c0_i32, %c0_i32_0 : i32, i32
  }
  func.func @transform_2(%arg0: i32) -> (i32, i32) {
    %c0_i32 = arith.constant 0 : i32
    %c0_i32_0 = arith.constant 0 : i32
    %c0_i32_1 = arith.constant 0 : i32
    return %c0_i32, %c0_i32_0 : i32, i32
  }
  func.func @transform_3(%arg0: i32) -> (i32, i32) {
    %c0_i32 = arith.constant 0 : i32
    %c0_i32_0 = arith.constant 0 : i32
    %c0_i32_1 = arith.constant 0 : i32
    return %c0_i32, %c0_i32_0 : i32, i32
  }
  func.func @transform_4(%arg0: i32) -> (i32, i32) {
    %c0_i32 = arith.constant 0 : i32
    %c0_i32_0 = arith.constant 0 : i32
    %c0_i32_1 = arith.constant 0 : i32
    return %c0_i32, %c0_i32_0 : i32, i32
  }
  func.func @transform_5(%arg0: i32) -> (i32, i32) {
    %c0_i32 = arith.constant 0 : i32
    %c0_i32_0 = arith.constant 0 : i32
    %c0_i32_1 = arith.constant 0 : i32
    return %c0_i32, %c0_i32_0 : i32, i32
  }
  func.func @transform_6(%arg0: i32) -> (i32, i32) {
    %c0_i32 = arith.constant 0 : i32
    %c0_i32_0 = arith.constant 0 : i32
    return %c0_i32, %arg0 : i32, i32
  }
}

module attributes {stable_mosaic.version = 11 : i64} {
  func.func @_fused_gemm_kernel(%arg0: i32, %arg1: memref<72x128xbf16, #tpu.memory_space<vmem>>, %arg2: memref<8x72xbf16, #tpu.memory_space<vmem>>, %arg3: memref<8x1xf32, #tpu.memory_space<vmem>>, %arg4: memref<8x128xbf16, #tpu.memory_space<vmem>>) attributes {dimension_semantics = [#tpu.dimension_semantics<parallel>], iteration_bounds = array<i64: 1>, scalar_prefetch = 0 : i64, scratch_operands = 0 : i64, tpu.core_type = #tpu.core_type<tc>, window_params = [{transform_indices = @transform_0, window_bounds = array<i64: 72, 128>}, {pipeline_mode = #tpu.pipeline_mode<synchronous>, transform_indices = @transform_1, window_bounds = array<i64: 8, 72>}, {pipeline_mode = #tpu.pipeline_mode<synchronous>, transform_indices = @transform_2, window_bounds = array<i64: 8, 1>}, {transform_indices = @transform_3, window_bounds = array<i64: 8, 128>}]} {
    %c0 = arith.constant 0 : index
    %c0_0 = arith.constant 0 : index
    %0 = vector.load %arg1[%c0, %c0_0] : memref<72x128xbf16, #tpu.memory_space<vmem>>, vector<72x128xbf16>
    %c0_1 = arith.constant 0 : index
    %c0_2 = arith.constant 0 : index
    %1 = vector.load %arg2[%c0_1, %c0_2] : memref<8x72xbf16, #tpu.memory_space<vmem>>, vector<8x72xbf16>
    %cst = arith.constant dense<0.000000e+00> : vector<8x128xf32>
    %2 = tpu.matmul %1, %0, %cst {dimension_numbers = #tpu.dot_dimension_numbers<[1], [0], [0], [1], [0, 0, 1, 1], [], []>} : vector<8x72xbf16>, vector<72x128xbf16>, vector<8x128xf32> -> vector<8x128xf32>
    %c0_3 = arith.constant 0 : index
    %c0_4 = arith.constant 0 : index
    %3 = vector.load %arg3[%c0_3, %c0_4] : memref<8x1xf32, #tpu.memory_space<vmem>>, vector<8x1xf32>
    %4 = vector.broadcast %3 : vector<8x1xf32> to vector<8x128xf32>
    %5 = arith.addf %2, %4 : vector<8x128xf32>
    %6 = arith.truncf %5 : vector<8x128xf32> to vector<8x128xbf16>
    %c0_5 = arith.constant 0 : index
    %c0_6 = arith.constant 0 : index
    %7 = vector.load %arg4[%c0_5, %c0_6] : memref<8x128xbf16, #tpu.memory_space<vmem>>, vector<8x128xbf16>
    tpu.vector_store %arg4[%c0_5, %c0_6], %6 {strides = array<i32>} : memref<8x128xbf16, #tpu.memory_space<vmem>>, vector<8x128xbf16>,
    return
  }
  func.func @transform_0(%arg0: i32) -> (i32, i32) {
    %c0_i32 = arith.constant 0 : i32
    %c0_i32_0 = arith.constant 0 : i32
    return %c0_i32, %arg0 : i32, i32
  }
  func.func @transform_1(%arg0: i32) -> (i32, i32) {
    %c0_i32 = arith.constant 0 : i32
    %c0_i32_0 = arith.constant 0 : i32
    %c0_i32_1 = arith.constant 0 : i32
    return %c0_i32, %c0_i32_0 : i32, i32
  }
  func.func @transform_2(%arg0: i32) -> (i32, i32) {
    %c0_i32 = arith.constant 0 : i32
    %c0_i32_0 = arith.constant 0 : i32
    %c0_i32_1 = arith.constant 0 : i32
    return %c0_i32, %c0_i32_0 : i32, i32
  }
  func.func @transform_3(%arg0: i32) -> (i32, i32) {
    %c0_i32 = arith.constant 0 : i32
    %c0_i32_0 = arith.constant 0 : i32
    return %c0_i32, %arg0 : i32, i32
  }
}

module attributes {stable_mosaic.version = 11 : i64} {
  func.func @_fused_gemm_kernel(%arg0: i32, %arg1: memref<72x128xbf16, #tpu.memory_space<vmem>>, %arg2: memref<32x72xbf16, #tpu.memory_space<vmem>>, %arg3: memref<32x1xf32, #tpu.memory_space<vmem>>, %arg4: memref<32x128xbf16, #tpu.memory_space<vmem>>) attributes {dimension_semantics = [#tpu.dimension_semantics<parallel>], iteration_bounds = array<i64: 1>, scalar_prefetch = 0 : i64, scratch_operands = 0 : i64, tpu.core_type = #tpu.core_type<tc>, window_params = [{transform_indices = @transform_0, window_bounds = array<i64: 72, 128>}, {pipeline_mode = #tpu.pipeline_mode<synchronous>, transform_indices = @transform_1, window_bounds = array<i64: 32, 72>}, {pipeline_mode = #tpu.pipeline_mode<synchronous>, transform_indices = @transform_2, window_bounds = array<i64: 32, 1>}, {transform_indices = @transform_3, window_bounds = array<i64: 32, 128>}]} {
    %c0 = arith.constant 0 : index
    %c0_0 = arith.constant 0 : index
    %0 = vector.load %arg1[%c0, %c0_0] : memref<72x128xbf16, #tpu.memory_space<vmem>>, vector<72x128xbf16>
    %c0_1 = arith.constant 0 : index
    %c0_2 = arith.constant 0 : index
    %1 = vector.load %arg2[%c0_1, %c0_2] : memref<32x72xbf16, #tpu.memory_space<vmem>>, vector<32x72xbf16>
    %cst = arith.constant dense<0.000000e+00> : vector<32x128xf32>
    %2 = tpu.matmul %1, %0, %cst {dimension_numbers = #tpu.dot_dimension_numbers<[1], [0], [0], [1], [0, 0, 1, 1], [], []>} : vector<32x72xbf16>, vector<72x128xbf16>, vector<32x128xf32> -> vector<32x128xf32>
    %c0_3 = arith.constant 0 : index
    %c0_4 = arith.constant 0 : index
    %3 = vector.load %arg3[%c0_3, %c0_4] : memref<32x1xf32, #tpu.memory_space<vmem>>, vector<32x1xf32>
    %4 = vector.broadcast %3 : vector<32x1xf32> to vector<32x128xf32>
    %5 = arith.addf %2, %4 : vector<32x128xf32>
    %6 = arith.truncf %5 : vector<32x128xf32> to vector<32x128xbf16>
    %c0_5 = arith.constant 0 : index
    %c0_6 = arith.constant 0 : index
    %7 = vector.load %arg4[%c0_5, %c0_6] : memref<32x128xbf16, #tpu.memory_space<vmem>>, vector<32x128xbf16>
    tpu.vector_store %arg4[%c0_5, %c0_6], %6 {strides = array<i32>} : memref<32x128xbf16, #tpu.memory_space<vmem>>, vector<32x128xbf16>,
    return
  }
  func.func @transform_0(%arg0: i32) -> (i32, i32) {
    %c0_i32 = arith.constant 0 : i32
    %c0_i32_0 = arith.constant 0 : i32
    return %c0_i32, %arg0 : i32, i32
  }
  func.func @transform_1(%arg0: i32) -> (i32, i32) {
    %c0_i32 = arith.constant 0 : i32
    %c0_i32_0 = arith.constant 0 : i32
    %c0_i32_1 = arith.constant 0 : i32
    return %c0_i32, %c0_i32_0 : i32, i32
  }
  func.func @transform_2(%arg0: i32) -> (i32, i32) {
    %c0_i32 = arith.constant 0 : i32
    %c0_i32_0 = arith.constant 0 : i32
    %c0_i32_1 = arith.constant 0 : i32
    return %c0_i32, %c0_i32_0 : i32, i32
  }
  func.func @transform_3(%arg0: i32) -> (i32, i32) {
    %c0_i32 = arith.constant 0 : i32
    %c0_i32_0 = arith.constant 0 : i32
    return %c0_i32, %arg0 : i32, i32
  }
}

module attributes {stable_mosaic.version = 11 : i64} {
  func.func @_fused_gemm_kernel(%arg0: i32, %arg1: memref<72x512xbf16, #tpu.memory_space<vmem>>, %arg2: memref<3x72xbf16, #tpu.memory_space<vmem>>, %arg3: memref<3x1xf32, #tpu.memory_space<vmem>>, %arg4: memref<3x512xbf16, #tpu.memory_space<vmem>>) attributes {dimension_semantics = [#tpu.dimension_semantics<parallel>], iteration_bounds = array<i64: 1>, scalar_prefetch = 0 : i64, scratch_operands = 0 : i64, tpu.core_type = #tpu.core_type<tc>, window_params = [{transform_indices = @transform_0, window_bounds = array<i64: 72, 512>}, {pipeline_mode = #tpu.pipeline_mode<synchronous>, transform_indices = @transform_1, window_bounds = array<i64: 3, 72>}, {pipeline_mode = #tpu.pipeline_mode<synchronous>, transform_indices = @transform_2, window_bounds = array<i64: 3, 1>}, {transform_indices = @transform_3, window_bounds = array<i64: 3, 512>}]} {
    %c0 = arith.constant 0 : index
    %c0_0 = arith.constant 0 : index
    %0 = vector.load %arg1[%c0, %c0_0] : memref<72x512xbf16, #tpu.memory_space<vmem>>, vector<72x512xbf16>
    %c0_1 = arith.constant 0 : index
    %c0_2 = arith.constant 0 : index
    %1 = vector.load %arg2[%c0_1, %c0_2] : memref<3x72xbf16, #tpu.memory_space<vmem>>, vector<3x72xbf16>
    %cst = arith.constant dense<0.000000e+00> : vector<3x512xf32>
    %2 = tpu.matmul %1, %0, %cst {dimension_numbers = #tpu.dot_dimension_numbers<[1], [0], [0], [1], [0, 0, 1, 1], [], []>} : vector<3x72xbf16>, vector<72x512xbf16>, vector<3x512xf32> -> vector<3x512xf32>
    %c0_3 = arith.constant 0 : index
    %c0_4 = arith.constant 0 : index
    %3 = vector.load %arg3[%c0_3, %c0_4] : memref<3x1xf32, #tpu.memory_space<vmem>>, vector<3x1xf32>
    %4 = vector.broadcast %3 : vector<3x1xf32> to vector<3x512xf32>
    %5 = arith.addf %2, %4 : vector<3x512xf32>
    %6 = arith.truncf %5 : vector<3x512xf32> to vector<3x512xbf16>
    %c0_5 = arith.constant 0 : index
    %c0_6 = arith.constant 0 : index
    %7 = vector.load %arg4[%c0_5, %c0_6] : memref<3x512xbf16, #tpu.memory_space<vmem>>, vector<3x512xbf16>
    tpu.vector_store %arg4[%c0_5, %c0_6], %6 {strides = array<i32>} : memref<3x512xbf16, #tpu.memory_space<vmem>>, vector<3x512xbf16>,
    return
  }
  func.func @transform_0(%arg0: i32) -> (i32, i32) {
    %c0_i32 = arith.constant 0 : i32
    %c0_i32_0 = arith.constant 0 : i32
    return %c0_i32, %arg0 : i32, i32
  }
  func.func @transform_1(%arg0: i32) -> (i32, i32) {
    %c0_i32 = arith.constant 0 : i32
    %c0_i32_0 = arith.constant 0 : i32
    %c0_i32_1 = arith.constant 0 : i32
    return %c0_i32, %c0_i32_0 : i32, i32
  }
  func.func @transform_2(%arg0: i32) -> (i32, i32) {
    %c0_i32 = arith.constant 0 : i32
    %c0_i32_0 = arith.constant 0 : i32
    %c0_i32_1 = arith.constant 0 : i32
    return %c0_i32, %c0_i32_0 : i32, i32
  }
  func.func @transform_3(%arg0: i32) -> (i32, i32) {
    %c0_i32 = arith.constant 0 : i32
    %c0_i32_0 = arith.constant 0 : i32
    return %c0_i32, %arg0 : i32, i32
  }
}

</mosaic_0001>

<bundles_post_ra>
// kernel: rdn_forward.16
= control target key start
LH: loop header
LB: loop body
LE: loop exit
PB: predicated region body
PF: predicated region fallthrough
CT: control target
= control target key end

     0   :  { %vm114_vm0 = vcmask 1040384   ;;  %vm115_vm1 = vcmask 1041408   ;;  %v218_v1 = vmov 65535   ;;  %v219_v4 = vmov 0   ;;  %s295_s0 = inlined_call_operand.vmem [shape: bf16[147,128], index: 0, kind: input, shape index: {}]   ;;  %s296_s2 = inlined_call_operand.vmem [shape: f32[8,1], index: 2, kind: input, shape index: {}]   ;;  %s297_s1 = inlined_call_operand.vmem [shape: bf16[8,147], index: 1, kind: input, shape index: {}]   ;;  %s298_s4 = inlined_call_operand.vmem [shape: f32[8,1], index: 4, kind: input, shape index: {}]   ;;  %s299_s3 = inlined_call_operand.vmem [shape: f32[8,1], index: 3, kind: input, shape index: {}]   ;;  %s300_s5 = inlined_call_operand.vmem [shape: bf16[8,128], index: 5, kind: output, shape index: {}]  }
   0x1   :  { %v212_v0 = vld [vmem:[%s295_s0 + $0x38] sm:$0xff]  ;;  %v116_v2 = vsel %vm114_vm0, 4294967295, %v218_v1  ;;  %v39_v3 = vld [vmem:[%s295_s0 + $0x48] sm:$0x3]  ;;  %216 = vset.pattern.permute.xlu0 %v219_v4  ;;  %217 = vset.pattern.permute.xlu1 %v219_v4  ;;  %v211_v5 = vld [vmem:[%s295_s0 + $0x30] sm:$0xff]  ;;  %vm110_vm2 = vcmask 154624  }
   0x2   :  { %121 = vmatpush.bf16.msra.mxu0 %v212_v0  ;;  %v90_v6 = vunpack.c.l.b16 %v39_v3  ;;  %v117_v7 = vsel %vm115_vm1, %v116_v2, 0  ;;  %v41_v8 = vld [vmem:[%s296_s2] sm:$0xff]  ;;  %v210_v12 = vld [vmem:[%s295_s0 + $0x28] sm:$0xff]  ;;  %v208_v19 = vld [vmem:[%s295_s0 + $0x18] sm:$0xff] }
   0x3   :  { %v40_v10 = vld [vmem:[%s297_s1] sm:$0xff]  ;;  %44 = vperm.xlu0 %216, %v41_v8   ;;  %v207_v20 = vld [vmem:[%s295_s0 + $0x10] sm:$0xff]  ;;  %v206_v21 = vld [vmem:[%s295_s0 + $0x8] sm:$0xff] }
   0x4   :  { %v100_v9 = vpack.c.b16 %v90_v6, %v90_v6  ;;  %v154_v11 = vld [vmem:[%s298_s4] sm:$0xff]  ;;  %v49_v14 = vunpack.c.h.b16 %v40_v10  ;;  %v48_v22 = vunpack.c.l.b16 %v40_v10 }
   0x5   :  { %157 = vperm.xlu1 %217, %v154_v11   ;;  %v213_v15 = vld [vmem:[%s295_s0 + $0x40] sm:$0xff] }
   0x6   :  { %122 = vmatpush.bf16.msra.mxu0 %v211_v5  ;;  %v119_v13 = vand.u32 %v117_v7, %v100_v9  ;;  %v147_v16 = vld [vmem:[%s299_s3] sm:$0xff]  ;;  %v51_v18 = vpack.c.b16 %v49_v14, %v49_v14  ;;  %v50_v24 = vpack.c.b16 %v48_v22, %v48_v22 }
   0x7   :  { %v209_v17 = vld [vmem:[%s295_s0 + $0x20] sm:$0xff] }
   0x8   :  { %140 = vmatpush.bf16.msra.mxu1 %v119_v13  ;;  %v205_v23 = vld [vmem:[%s295_s0] sm:$0xff] }
   0xa   :  { %123 = vmatpush.bf16.msra.mxu0 %v210_v12 }
   0xb   :  { %150 = vperm.xlu0 %216, %v147_v16  }
   0xc   :  { %141 = vmatpush.bf16.msra.mxu1 %v213_v15 }
   0xe   :  { %124 = vmatpush.bf16.msra.mxu0 %v209_v17 }
   0xf   :  { %204 = vmatmul.msk.bf16.vlgmr.msra.gmra.mxu1 %vm110_vm2, %v51_v18 }
  0x12   :  { %125 = vmatpush.bf16.msra.mxu0 %v208_v19 }
  0x16   :  { %126 = vmatpush.bf16.msra.mxu0 %v207_v20 }
  0x1a   :  { %127 = vmatpush.bf16.msra.mxu0 %v206_v21 }
  0x1e   :  { %128 = vmatpush.bf16.msra.mxu0 %v205_v23 }
  0x21   :  { %129 = vmatmul.bf16.vlgmr.msra.gmra.mxu0 %v50_v24 }
  0x75   :  { %v45_v27 = vpop.permute.xlu0 %44 }
  0x77   :  { %v158_v32 = vpop.permute.xlu1 %157 }
  0x7d   :  { %v151_v31 = vpop.permute.xlu0 %150 }
  0x8c   :  { %v143_v25 = vpop.f32.mrf.mxu1 }
  0x94   :  { %v145_v26 = vpop.f32.mrf.mxu1 }
  0x9e   :  { %v130_v28 = vpop.f32.mrf.mxu0 }
  0x9f   :  { %v131_v29 = vadd.f32 %v130_v28, %v45_v27 }
  0xa1   :  { %v144_v30 = vadd.f32 %v143_v25, %v131_v29 }
  0xa3   :  { %v153_v33 = vmul.f32 %v151_v31, %v144_v30 }
  0xa5   :  { %v160_v34 = vadd.f32 %v158_v32, %v153_v33 }
  0xa6   :  { %v132_v35 = vpop.f32.mrf.mxu0 }
  0xa7   :  { %v161_v36 = vmax.f32 %v160_v34, 0.0 }
  0xa9   :  { %v162_v37 = vpack.c.bf16 %v161_v36, %v161_v36 }
  0xab   :  { %163 = vst [vmem:[%s300_s5] sm:$0xf] %v162_v37 }

// kernel: rdn_forward.18
= control target key start
LH: loop header
LB: loop body
LE: loop exit
PB: predicated region body
PF: predicated region fallthrough
CT: control target
= control target key end

     0   :  { %v89_v0 = vmov 0   ;;  %vm47_vm0 = vcmask 1043456   ;;  %vm43_vm1 = vcmask 64512   ;;  %s146_s2 = inlined_call_operand.vmem [shape: f32[8,1], index: 2, kind: input, shape index: {}]   ;;  %s147_s3 = inlined_call_operand.vmem [shape: f32[8,1], index: 3, kind: input, shape index: {}]   ;;  %s148_s4 = inlined_call_operand.vmem [shape: f32[8,1], index: 4, kind: input, shape index: {}]   ;;  %s149_s5 = inlined_call_operand.vmem [shape: f32[8,1], index: 5, kind: input, shape index: {}]   ;;  %s150_s0 = inlined_call_operand.vmem [shape: bf16[8,128], index: 0, kind: input, shape index: {}]   ;;  %s151_s1 = inlined_call_operand.vmem [shape: bf16[8,8], index: 1, kind: input, shape index: {}]   ;;  %s152_s6 = inlined_call_operand.vmem [shape: bf16[8,128], index: 6, kind: output, shape index: {}]  }
   0x1   :  { %87 = vset.pattern.permute.xlu0 %v89_v0  ;;  %v26_v1 = vld [vmem:[%s146_s2] sm:$0xff]  ;;  %88 = vset.pattern.permute.xlu1 %v89_v0 }
   0x2   :  { %29 = vperm.xlu0 %87, %v26_v1   ;;  %v33_v2 = vld [vmem:[%s147_s3] sm:$0xff] }
   0x3   :  { %v64_v3 = vld [vmem:[%s148_s4] sm:$0xff] }
   0x4   :  { %67 = vperm.xlu1 %88, %v64_v3   ;;  %v71_v4 = vld [vmem:[%s149_s5] sm:$0xff] }
   0x5   :  { %v24_v6 = vld [vmem:[%s150_s0] sm:$0xf] }
   0x6   :  { %v25_v7 = vunpack.c.l.bf16 %v24_v6  ;;  %v42_v14 = vld [vmem:[%s151_s1] sm:$0xf] }
   0xa   :  { %36 = vperm.xlu0 %87, %v33_v2  }
   0xc   :  { %74 = vperm.xlu1 %88, %v71_v4  }
  0x74   :  { %v30_v5 = vpop.permute.xlu0 %29 }
  0x75   :  { %v32_v8 = vmul.f32 %v30_v5, %v25_v7 }
  0x76   :  { %v68_v15 = vpop.permute.xlu1 %67 }
  0x7c   :  { %v37_v9 = vpop.permute.xlu0 %36 }
  0x7d   :  { %v39_v10 = vadd.f32 %v37_v9, %v32_v8 }
  0x7e   :  { %v75_v18 = vpop.permute.xlu1 %74 }
  0x7f   :  { %v40_v11 = vmax.f32 %v39_v10, 0.0 }
  0x81   :  { %v41_v12 = vpack.c.bf16 %v40_v11, %v40_v11 }
  0x83   :  { %v49_v13 = vsel %vm47_vm0, %v41_v12, 0 }
  0x84   :  { %58 = vmatpush.bf16.msra.mxu0 %v49_v13 }
  0x87   :  { %85 = vmatmul.msk.bf16.vlgmr.msra.gmra.mxu0 %vm43_vm1, %v42_v14 }
 0x104   :  { %v60_v16 = vpop.f32.mrf.mxu0 }
 0x105   :  { %v70_v17 = vmul.f32 %v68_v15, %v60_v16 }
 0x107   :  { %v77_v19 = vadd.f32 %v75_v18, %v70_v17 }
 0x109   :  { %v78_v20 = vmax.f32 %v77_v19, 0.0 }
 0x10b   :  { %v79_v21 = vpack.c.bf16 %v78_v20, %v78_v20 }
 0x10c   :  { %v62_v22 = vpop.f32.mrf.mxu0 }
 0x10d   :  { %80 = vst [vmem:[%s152_s6] sm:$0xf] %v79_v21 }

// kernel: rdn_forward.17
= control target key start
LH: loop header
LB: loop body
LE: loop exit
PB: predicated region body
PF: predicated region fallthrough
CT: control target
= control target key end

     0   :  { %v130_v1 = vmov 0   ;;  %vm68_vm0 = vcmask 1043456   ;;  %vm64_vm1 = vcmask 588800   ;;  %s191_s0 = inlined_call_operand.vmem [shape: bf16[72,128], index: 0, kind: input, shape index: {}]   ;;  %s192_s2 = inlined_call_operand.vmem [shape: f32[8,1], index: 2, kind: input, shape index: {}]   ;;  %s193_s4 = inlined_call_operand.vmem [shape: f32[8,1], index: 4, kind: input, shape index: {}]   ;;  %s194_s3 = inlined_call_operand.vmem [shape: f32[8,1], index: 3, kind: input, shape index: {}]   ;;  %s195_s1 = inlined_call_operand.vmem [shape: bf16[8,72], index: 1, kind: input, shape index: {}]   ;;  %s196_s5 = inlined_call_operand.vmem [shape: bf16[8,128], index: 5, kind: output, shape index: {}]  }
   0x1   :  { %v29_v0 = vld [vmem:[%s191_s0 + $0x20] sm:$0xf]  ;;  %128 = vset.pattern.permute.xlu0 %v130_v1  ;;  %129 = vset.pattern.permute.xlu1 %v130_v1  ;;  %v126_v7 = vld [vmem:[%s191_s0 + $0x18] sm:$0xff]  ;;  %v125_v9 = vld [vmem:[%s191_s0 + $0x10] sm:$0xff] }
   0x2   :  { %v54_v2 = vunpack.c.l.b16 %v29_v0  ;;  %v31_v3 = vld [vmem:[%s192_s2] sm:$0xff]  ;;  %v124_v10 = vld [vmem:[%s191_s0 + $0x8] sm:$0xff] }
   0x3   :  { %34 = vperm.xlu0 %128, %v31_v3   ;;  %v92_v4 = vld [vmem:[%s193_s4] sm:$0xff] }
   0x4   :  { %v59_v5 = vpack.c.b16 %v54_v2, %v54_v2  ;;  %95 = vperm.xlu1 %129, %v92_v4   ;;  %v85_v8 = vld [vmem:[%s194_s3] sm:$0xff] }
   0x5   :  { %v123_v11 = vld [vmem:[%s191_s0] sm:$0xff] }
   0x6   :  { %v70_v6 = vsel %vm68_vm0, %v59_v5, 0  ;;  %v30_v12 = vld [vmem:[%s195_s1] sm:$0xf] }
   0x7   :  { %75 = vmatpush.bf16.msra.mxu0 %v70_v6 }
   0xb   :  { %76 = vmatpush.bf16.msra.mxu0 %v126_v7  ;;  %88 = vperm.xlu0 %128, %v85_v8  }
   0xf   :  { %77 = vmatpush.bf16.msra.mxu0 %v125_v9 }
  0x13   :  { %78 = vmatpush.bf16.msra.mxu0 %v124_v10 }
  0x17   :  { %79 = vmatpush.bf16.msra.mxu0 %v123_v11 }
  0x1a   :  { %122 = vmatmul.msk.bf16.vlgmr.msra.gmra.mxu0 %vm64_vm1, %v30_v12 }
  0x75   :  { %v35_v13 = vpop.permute.xlu0 %34 }
  0x76   :  { %v96_v17 = vpop.permute.xlu1 %95 }
  0x7d   :  { %v89_v16 = vpop.permute.xlu0 %88 }
  0x97   :  { %v81_v14 = vpop.f32.mrf.mxu0 }
  0x98   :  { %v82_v15 = vadd.f32 %v81_v14, %v35_v13 }
  0x9a   :  { %v91_v18 = vmul.f32 %v89_v16, %v82_v15 }
  0x9c   :  { %v98_v19 = vadd.f32 %v96_v17, %v91_v18 }
  0x9e   :  { %v99_v20 = vmax.f32 %v98_v19, 0.0 }
  0x9f   :  { %v83_v21 = vpop.f32.mrf.mxu0 }
  0xa0   :  { %v100_v22 = vpack.c.bf16 %v99_v20, %v99_v20 }
  0xa2   :  { %101 = vst [vmem:[%s196_s5] sm:$0xf] %v100_v22 }

// kernel: rdn_forward.19
= control target key start
LH: loop header
LB: loop body
LE: loop exit
PB: predicated region body
PF: predicated region fallthrough
CT: control target
= control target key end

     0   :  { %vm53_vm0 = vcmask 1043456   ;;  %vm49_vm1 = vcmask 588800   ;;  %s133_s0 = inlined_call_operand.vmem [shape: bf16[72,128], index: 0, kind: input, shape index: {}]   ;;  %s134_s1 = inlined_call_operand.vmem [shape: bf16[4,72], index: 1, kind: input, shape index: {}]   ;;  %s135_s2 = inlined_call_operand.vmem [shape: bf16[4,128], index: 2, kind: output, shape index: {}]  }
   0x1   :  { %v20_v0 = vld [vmem:[%s133_s0 + $0x20] sm:$0xf]  ;;  %v96_v4 = vld [vmem:[%s133_s0 + $0x18] sm:$0xff]  ;;  %v95_v5 = vld [vmem:[%s133_s0 + $0x10] sm:$0xff] }
   0x2   :  { %v39_v1 = vunpack.c.l.b16 %v20_v0  ;;  %v94_v6 = vld [vmem:[%s133_s0 + $0x8] sm:$0xff]  ;;  %v93_v7 = vld [vmem:[%s133_s0] sm:$0xff] }
   0x3   :  { %v21_v8 = vld [vmem:[%s134_s1] sm:$0x3] }
   0x4   :  { %v44_v2 = vpack.c.b16 %v39_v1, %v39_v1 }
   0x6   :  { %v55_v3 = vsel %vm53_vm0, %v44_v2, 0 }
   0x7   :  { %60 = vmatpush.bf16.msra.mxu0 %v55_v3 }
   0xb   :  { %61 = vmatpush.bf16.msra.mxu0 %v96_v4 }
   0xf   :  { %62 = vmatpush.bf16.msra.mxu0 %v95_v5 }
  0x13   :  { %63 = vmatpush.bf16.msra.mxu0 %v94_v6 }
  0x17   :  { %64 = vmatpush.bf16.msra.mxu0 %v93_v7 }
  0x1a   :  { %92 = vmatmul.msk.bf16.vlgmr.msra.gmra.mxu0 %vm49_vm1, %v21_v8 }
  0x97   :  { %v66_v9 = vpop.f32.mrf.mxu0 }
  0x98   :  { %v70_v10 = vpack.c.bf16 %v66_v9, %v66_v9 }
  0x9a   :  { %71 = vst [vmem:[%s135_s2] sm:$0x3] %v70_v10 }
  0x9f   :  { %v68_v11 = vpop.f32.mrf.mxu0 }

// kernel: rdn_forward.22
= control target key start
LH: loop header
LB: loop body
LE: loop exit
PB: predicated region body
PF: predicated region fallthrough
CT: control target
= control target key end

     0   :  { %v61_v1 = vmov 0   ;;  %vm30_vm0 = vcmask 130048   ;;  %s94_s0 = inlined_call_operand.vmem [shape: bf16[16,128], index: 0, kind: input, shape index: {}]   ;;  %s95_s1 = inlined_call_operand.vmem [shape: bf16[8,16], index: 1, kind: input, shape index: {}]   ;;  %s96_s2 = inlined_call_operand.vmem [shape: f32[8,1], index: 2, kind: input, shape index: {}]   ;;  %s97_s3 = inlined_call_operand.vmem [shape: bf16[8,128], index: 3, kind: output, shape index: {}]  }
   0x1   :  { %v58_v0 = vld [vmem:[%s94_s0] sm:$0xff]  ;;  %60 = vset.pattern.permute.xlu0 %v61_v1 }
   0x2   :  { %v18_v2 = vld [vmem:[%s96_s2] sm:$0xff]  ;;  %41 = vmatpush.bf16.msra.mxu0 %v58_v0 }
   0x3   :  { %21 = vperm.xlu0 %60, %v18_v2   ;;  %v17_v3 = vld [vmem:[%s95_s1] sm:$0xf] }
   0x5   :  { %57 = vmatmul.msk.bf16.vlgmr.msra.gmra.mxu0 %vm30_vm0, %v17_v3 }
  0x75   :  { %v22_v4 = vpop.permute.xlu0 %21 }
  0x82   :  { %v43_v5 = vpop.f32.mrf.mxu0 }
  0x83   :  { %v44_v6 = vadd.f32 %v43_v5, %v22_v4 }
  0x85   :  { %v47_v7 = vpack.c.bf16 %v44_v6, %v44_v6 }
  0x87   :  { %48 = vst [vmem:[%s97_s3] sm:$0xf] %v47_v7 }
  0x8a   :  { %v45_v8 = vpop.f32.mrf.mxu0 }

// kernel: rdn_forward.29
= control target key start
LH: loop header
LB: loop body
LE: loop exit
PB: predicated region body
PF: predicated region fallthrough
CT: control target
= control target key end

     0   :  { %v108_v1 = vmov 0   ;;  %vm62_vm0 = vcmask 1043456   ;;  %vm58_vm1 = vcmask 588800   ;;  %s153_s0 = inlined_call_operand.vmem [shape: bf16[72,128], index: 0, kind: input, shape index: {}]   ;;  %s154_s2 = inlined_call_operand.vmem [shape: f32[8,1], index: 2, kind: input, shape index: {}]   ;;  %s155_s1 = inlined_call_operand.vmem [shape: bf16[8,72], index: 1, kind: input, shape index: {}]   ;;  %s156_s3 = inlined_call_operand.vmem [shape: bf16[8,128], index: 3, kind: output, shape index: {}]  }
   0x1   :  { %v23_v0 = vld [vmem:[%s153_s0 + $0x20] sm:$0xf]  ;;  %107 = vset.pattern.permute.xlu0 %v108_v1  ;;  %v105_v6 = vld [vmem:[%s153_s0 + $0x18] sm:$0xff]  ;;  %v104_v7 = vld [vmem:[%s153_s0 + $0x10] sm:$0xff] }
   0x2   :  { %v48_v2 = vunpack.c.l.b16 %v23_v0  ;;  %v25_v3 = vld [vmem:[%s154_s2] sm:$0xff]  ;;  %v103_v8 = vld [vmem:[%s153_s0 + $0x8] sm:$0xff] }
   0x3   :  { %28 = vperm.xlu0 %107, %v25_v3   ;;  %v102_v9 = vld [vmem:[%s153_s0] sm:$0xff] }
   0x4   :  { %v53_v4 = vpack.c.b16 %v48_v2, %v48_v2  ;;  %v24_v10 = vld [vmem:[%s155_s1] sm:$0xf] }
   0x6   :  { %v64_v5 = vsel %vm62_vm0, %v53_v4, 0 }
   0x7   :  { %69 = vmatpush.bf16.msra.mxu0 %v64_v5 }
   0xb   :  { %70 = vmatpush.bf16.msra.mxu0 %v105_v6 }
   0xf   :  { %71 = vmatpush.bf16.msra.mxu0 %v104_v7 }
  0x13   :  { %72 = vmatpush.bf16.msra.mxu0 %v103_v8 }
  0x17   :  { %73 = vmatpush.bf16.msra.mxu0 %v102_v9 }
  0x1a   :  { %101 = vmatmul.msk.bf16.vlgmr.msra.gmra.mxu0 %vm58_vm1, %v24_v10 }
  0x75   :  { %v29_v11 = vpop.permute.xlu0 %28 }
  0x97   :  { %v75_v12 = vpop.f32.mrf.mxu0 }
  0x98   :  { %v76_v13 = vadd.f32 %v75_v12, %v29_v11 }
  0x9a   :  { %v79_v14 = vpack.c.bf16 %v76_v13, %v76_v13 }
  0x9c   :  { %80 = vst [vmem:[%s156_s3] sm:$0xf] %v79_v14 }
  0x9f   :  { %v77_v15 = vpop.f32.mrf.mxu0 }

// kernel: rdn_forward.20
= control target key start
LH: loop header
LB: loop body
LE: loop exit
PB: predicated region body
PF: predicated region fallthrough
CT: control target
= control target key end

     0   :  { %v107_v0 = vmov 0   ;;  %vm64_vm0 = vcmask 1045504   ;;  %vm60_vm1 = vcmask 97280   ;;  %s173_s3 = inlined_call_operand.vmem [shape: f32[12,1], index: 3, kind: input, shape index: {}]   ;;  %s174_s2 = inlined_call_operand.vmem [shape: f32[12,1], index: 2, kind: input, shape index: {}]   ;;  %s175_s4 = inlined_call_operand.vmem [shape: f32[8,1], index: 4, kind: input, shape index: {}]   ;;  %s176_s5 = inlined_call_operand.vmem [shape: f32[8,1], index: 5, kind: input, shape index: {}]   ;;  %s177_s0 = inlined_call_operand.vmem [shape: bf16[12,128], index: 0, kind: input, shape index: {}]   ;;  %s178_s1 = inlined_call_operand.vmem [shape: bf16[8,12], index: 1, kind: input, shape index: {}]   ;;  %s179_s6 = inlined_call_operand.vmem [shape: bf16[8,128], index: 6, kind: output, shape index: {}]  }
   0x1   :  { %105 = vset.pattern.permute.xlu1 %v107_v0  ;;  %104 = vset.pattern.permute.xlu0 %v107_v0  ;;  %v42_v1 = vld [vmem:[%s173_s3] sm:$0xff]  ;;  %v43_v3 = vld [vmem:[%s173_s3 + $0x8] sm:$0xf] }
   0x2   :  { %v28_v2 = vld [vmem:[%s174_s2] sm:$0xff]  ;;  %46 = vperm.xlu1 %105, %v42_v1   ;;  %106 = vset.pattern.permute.xlu2 %v107_v0  ;;  %v29_v4 = vld [vmem:[%s174_s2 + $0x8] sm:$0xf] }
   0x3   :  { %32 = vperm.xlu0 %104, %v28_v2   ;;  %v81_v5 = vld [vmem:[%s175_s4] sm:$0xff] }
   0x4   :  { %84 = vperm.xlu2 %106, %v81_v5   ;;  %v88_v6 = vld [vmem:[%s176_s5] sm:$0xff] }
   0x5   :  { %v24_v7 = vld [vmem:[%s177_s0] sm:$0xf]  ;;  %v25_v11 = vld [vmem:[%s177_s0 + $0x4] sm:$0x3] }
   0x6   :  { %v26_v10 = vunpack.c.l.bf16 %v24_v7  ;;  %v27_v13 = vunpack.c.l.bf16 %v25_v11  ;;  %v59_v23 = vld [vmem:[%s178_s1] sm:$0xf] }
   0xa   :  { %51 = vperm.xlu1 %105, %v43_v3  }
   0xb   :  { %37 = vperm.xlu0 %104, %v29_v4  }
   0xc   :  { %91 = vperm.xlu2 %106, %v88_v6  }
  0x5e   :  { %v85_v24 = vpop.permute.xlu2 %84 }
  0x66   :  { %v92_v27 = vpop.permute.xlu2 %91 }
  0x74   :  { %v47_v8 = vpop.permute.xlu1 %46 }
  0x75   :  { %v33_v9 = vpop.permute.xlu0 %32 }
  0x76   :  { %v40_v12 = vmul.f32 %v33_v9, %v26_v10 }
  0x78   :  { %v54_v15 = vadd.f32 %v47_v8, %v40_v12 }
  0x7a   :  { %v56_v19 = vmax.f32 %v54_v15, 0.0 }
  0x7c   :  { %v52_v17 = vpop.permute.xlu1 %51 }
  0x7d   :  { %v38_v14 = vpop.permute.xlu0 %37 }
  0x7e   :  { %v41_v16 = vmul.f32 %v38_v14, %v27_v13 }
  0x80   :  { %v55_v18 = vadd.f32 %v52_v17, %v41_v16 }
  0x82   :  { %v57_v20 = vmax.f32 %v55_v18, 0.0 }
  0x84   :  { %v58_v21 = vpack.c.bf16 %v57_v20, %v56_v19 }
  0x86   :  { %v66_v22 = vsel %vm64_vm0, %v58_v21, 0 }
  0x87   :  { %75 = vmatpush.bf16.msra.mxu0 %v66_v22 }
  0x8a   :  { %102 = vmatmul.msk.bf16.vlgmr.msra.gmra.mxu0 %vm60_vm1, %v59_v23 }
 0x107   :  { %v77_v25 = vpop.f32.mrf.mxu0 }
 0x108   :  { %v87_v26 = vmul.f32 %v85_v24, %v77_v25 }
 0x10a   :  { %v94_v28 = vadd.f32 %v92_v27, %v87_v26 }
 0x10c   :  { %v95_v29 = vmax.f32 %v94_v28, 0.0 }
 0x10e   :  { %v96_v30 = vpack.c.bf16 %v95_v29, %v95_v29 }
 0x10f   :  { %v79_v31 = vpop.f32.mrf.mxu0 }
 0x110   :  { %97 = vst [vmem:[%s179_s6] sm:$0xf] %v96_v30 }

// kernel: rdn_forward.30
= control target key start
LH: loop header
LB: loop body
LE: loop exit
PB: predicated region body
PF: predicated region fallthrough
CT: control target
= control target key end

     0   :  { %v182_v1 = vmov 0   ;;  %vm96_vm0 = vcmask 1043456   ;;  %vm89_vm1 = vcmask 588800   ;;  %s242_s0 = inlined_call_operand.vmem [shape: bf16[72,128], index: 0, kind: input, shape index: {}]   ;;  %s243_s2 = inlined_call_operand.vmem [shape: f32[32,1], index: 2, kind: input, shape index: {}]   ;;  %s244_s1 = inlined_call_operand.vmem [shape: bf16[32,72], index: 1, kind: input, shape index: {}]   ;;  %s245_s3 = inlined_call_operand.vmem [shape: bf16[32,128], index: 3, kind: output, shape index: {}]  }
   0x1   :  { %v23_v0 = vld [vmem:[%s242_s0 + $0x20] sm:$0xf]  ;;  %181 = vset.pattern.permute.xlu1 %v182_v1  ;;  %180 = vset.pattern.permute.xlu0 %v182_v1  ;;  %v30_v3 = vld [vmem:[%s243_s2 + $0x10] sm:$0xff]  ;;  %v160_v7 = vld [vmem:[%s242_s0 + $0x18] sm:$0xff] }
   0x2   :  { %v79_v2 = vunpack.c.l.b16 %v23_v0  ;;  %v28_v4 = vld [vmem:[%s243_s2] sm:$0xff]  ;;  %44 = vperm.xlu1 %181, %v30_v3   ;;  %v31_v8 = vld [vmem:[%s243_s2 + $0x18] sm:$0xff]  ;;  %v29_v9 = vld [vmem:[%s243_s2 + $0x8] sm:$0xff] }
   0x3   :  { %34 = vperm.xlu0 %180, %v28_v4   ;;  %v159_v10 = vld [vmem:[%s242_s0 + $0x10] sm:$0xff]  ;;  %v158_v11 = vld [vmem:[%s242_s0 + $0x8] sm:$0xff]  ;;  %v157_v12 = vld [vmem:[%s242_s0] sm:$0xff] }
   0x4   :  { %v84_v5 = vpack.c.b16 %v79_v2, %v79_v2  ;;  %v161_v13 = vld [vmem:[%s244_s1] sm:$0xff]  ;;  %v162_v14 = vld [vmem:[%s244_s1 + $0x8] sm:$0xff] }
   0x6   :  { %v98_v6 = vsel %vm96_vm0, %v84_v5, 0 }
   0x7   :  { %103 = vmatpush.bf16.msra.mxu0 %v98_v6  ;;  %174 = vmatpush.bf16.msra.mxu1 %v98_v6 }
   0xa   :  { %49 = vperm.xlu1 %181, %v31_v8  }
   0xb   :  { %104 = vmatpush.bf16.msra.mxu0 %v160_v7  ;;  %175 = vmatpush.bf16.msra.mxu1 %v160_v7 }
   0xc   :  { %39 = vperm.xlu0 %180, %v29_v9  }
   0xf   :  { %105 = vmatpush.bf16.msra.mxu0 %v159_v10  ;;  %176 = vmatpush.bf16.msra.mxu1 %v159_v10 }
  0x13   :  { %106 = vmatpush.bf16.msra.mxu0 %v158_v11  ;;  %177 = vmatpush.bf16.msra.mxu1 %v158_v11 }
  0x17   :  { %107 = vmatpush.bf16.msra.mxu0 %v157_v12  ;;  %178 = vmatpush.bf16.msra.mxu1 %v157_v12 }
  0x1a   :  { %155 = vmatmul.msk.bf16.vlgmr.msra.gmra.mxu0 %vm89_vm1, %v161_v13  ;;  %156 = vmatmul.msk.bf16.vlgmr.msra.gmra.mxu1 %vm89_vm1, %v162_v14 }
  0x74   :  { %v45_v15 = vpop.permute.xlu1 %44 }
  0x75   :  { %v35_v16 = vpop.permute.xlu0 %34 }
  0x7c   :  { %v50_v19 = vpop.permute.xlu1 %49 }
  0x7e   :  { %v40_v20 = vpop.permute.xlu0 %39 }
  0x97   :  { %v109_v17 = vpop.f32.mrf.mxu0  ;;  %v114_v18 = vpop.f32.mrf.mxu1 }
  0x98   :  { %v110_v23 = vadd.f32 %v109_v17, %v35_v16  ;;  %v115_v24 = vadd.f32 %v114_v18, %v45_v15 }
  0x9f   :  { %v111_v21 = vpop.f32.mrf.mxu0  ;;  %v116_v22 = vpop.f32.mrf.mxu1 }
  0xa0   :  { %v112_v25 = vadd.f32 %v111_v21, %v40_v20  ;;  %v117_v26 = vadd.f32 %v116_v22, %v50_v19 }
  0xa2   :  { %v166_v27 = vpack.c.bf16 %v112_v25, %v110_v23  ;;  %v171_v28 = vpack.c.bf16 %v117_v26, %v115_v24 }
  0xa4   :  { %167 = vst [vmem:[%s245_s3] sm:$0xff] %v166_v27  }
  0xa5   :  { %173 = vst [vmem:[%s245_s3 + $0x8] sm:$0xff] %v171_v28  }

// kernel: rdn_forward.31
= control target key start
LH: loop header
LB: loop body
LE: loop exit
PB: predicated region body
PF: predicated region fallthrough
CT: control target
= control target key end

     0   :  { %v324_v2 = vmov 0   ;;  %vm134_vm0 = vcmask 1043456   ;;  %vm130_vm1 = vcmask 588800   ;;  %vm206_vm2 = vcmask 1041408   ;;  %s480_s0 = inlined_call_operand.vmem [shape: bf16[72,512], index: 0, kind: input, shape index: {}]   ;;  %s481_s2 = inlined_call_operand.vmem [shape: f32[3,1], index: 2, kind: input, shape index: {}]   ;;  %s482_s1 = inlined_call_operand.vmem [shape: bf16[3,72], index: 1, kind: input, shape index: {}]   ;;  %s483_s3 = inlined_call_operand.vmem [shape: bf16[3,512], index: 3, kind: output, shape index: {}]  }
   0x1   :  { %v31_v0 = vld [vmem:[%s480_s0 + $0x80] sm:$0xff]  ;;  %v32_v1 = vld [vmem:[%s480_s0 + $0x88] sm:$0xff]  ;;  %323 = vset.pattern.permute.xlu0 %v324_v2  ;;  %v320_v8 = vld [vmem:[%s480_s0 + $0x6c] sm:$0xf0]  ;;  %vm217_vm3 = vsmask.f32 1280 }
   0x2   :  { %v90_v3 = vunpack.c.l.b16 %v31_v0  ;;  %v91_v4 = vunpack.c.h.b16 %v31_v0  ;;  %v92_v5 = vunpack.c.l.b16 %v32_v1  ;;  %v93_v6 = vunpack.c.h.b16 %v32_v1  ;;  %v288_v7 = vld [vmem:[%s480_s0 + $0x60] sm:$0xf]  ;;  %v318_v13 = vld [vmem:[%s480_s0 + $0x64] sm:$0xf]  ;;  %v290_v14 = vld [vmem:[%s480_s0 + $0x70] sm:$0xf0] }
   0x3   :  { %v296_v15 = vld [vmem:[%s480_s0 + $0x68] sm:$0xf]  ;;  %v321_v16 = vld [vmem:[%s480_s0 + $0x74] sm:$0xf0]  ;;  %v319_v17 = vld [vmem:[%s480_s0 + $0x6c] sm:$0xf]  ;;  %v289_v23 = vor.u32 %v320_v8, %v288_v7  ;;  %v293_v24 = vor.u32 %v318_v13, %v290_v14 }
   0x4   :  { %v110_v9 = vpack.c.b16 %v90_v3, %v90_v3  ;;  %v111_v10 = vpack.c.b16 %v91_v4, %v91_v4  ;;  %v112_v11 = vpack.c.b16 %v92_v5, %v92_v5  ;;  %v113_v12 = vpack.c.b16 %v93_v6, %v93_v6  ;;  %v298_v18 = vld [vmem:[%s480_s0 + $0x78] sm:$0xf0]  ;;  %v272_v25 = vld [vmem:[%s480_s0 + $0x40] sm:$0xf]  ;;  %v316_v26 = vld [vmem:[%s480_s0 + $0x4c] sm:$0xf0] }
   0x5   :  { %v297_v27 = vor.u32 %v321_v16, %v296_v15  ;;  %v301_v28 = vor.u32 %v319_v17, %v298_v18  ;;  %v314_v29 = vld [vmem:[%s480_s0 + $0x44] sm:$0xf]  ;;  %v274_v30 = vld [vmem:[%s480_s0 + $0x50] sm:$0xf0]  ;;  %v280_v31 = vld [vmem:[%s480_s0 + $0x48] sm:$0xf]  ;;  %v273_v35 = vor.u32 %v316_v26, %v272_v25 }
   0x6   :  { %v136_v19 = vsel %vm134_vm0, %v110_v9, 0  ;;  %v139_v20 = vsel %vm134_vm0, %v111_v10, 0  ;;  %v142_v21 = vsel %vm134_vm0, %v112_v11, 0  ;;  %v145_v22 = vsel %vm134_vm0, %v113_v12, 0  ;;  %v317_v32 = vld [vmem:[%s480_s0 + $0x54] sm:$0xf0]  ;;  %vm458_vm6 = vmand %vm206_vm2, %vm217_vm3 }
   0x7   :  { %150 = vmatpush.bf16.msra.mxu0 %v136_v19  ;;  %163 = vmatpush.bf16.msra.mxu1 %v139_v20  ;;  %v315_v33 = vld [vmem:[%s480_s0 + $0x4c] sm:$0xf]  ;;  %v282_v34 = vld [vmem:[%s480_s0 + $0x58] sm:$0xf0]  ;;  %v277_v36 = vor.u32 %v314_v29, %v274_v30  ;;  %v256_v37 = vld [vmem:[%s480_s0 + $0x20] sm:$0xf]  ;;  %v281_v40 = vor.u32 %v317_v32, %v280_v31 }
   0x8   :  { %176 = vmatpush.bf16.msra.mxu2 %v142_v21  ;;  %189 = vmatpush.bf16.msra.mxu3 %v145_v22  ;;  %v312_v38 = vld [vmem:[%s480_s0 + $0x2c] sm:$0xf0]  ;;  %v310_v39 = vld [vmem:[%s480_s0 + $0x24] sm:$0xf]  ;;  %v285_v41 = vor.u32 %v315_v33, %v282_v34  ;;  %v258_v42 = vld [vmem:[%s480_s0 + $0x30] sm:$0xf0] }
   0x9   :  { %v264_v43 = vld [vmem:[%s480_s0 + $0x28] sm:$0xf]  ;;  %v313_v44 = vld [vmem:[%s480_s0 + $0x34] sm:$0xf0]  ;;  %v311_v45 = vld [vmem:[%s480_s0 + $0x2c] sm:$0xf]  ;;  %v257_v48 = vor.u32 %v312_v38, %v256_v37  ;;  %v261_v49 = vor.u32 %v310_v39, %v258_v42 }
   0xa   :  { %v266_v46 = vld [vmem:[%s480_s0 + $0x38] sm:$0xf0]  ;;  %v34_v47 = vld [vmem:[%s481_s2] sm:$0x7]  ;;  %v308_v51 = vld [vmem:[%s480_s0 + $0xc] sm:$0xf0]  ;;  %v265_v52 = vor.u32 %v313_v44, %v264_v43 }
   0xb   :  { %151 = vmatpush.bf16.msra.mxu0 %v289_v23  ;;  %164 = vmatpush.bf16.msra.mxu1 %v293_v24  ;;  %v240_v50 = vld [vmem:[%s480_s0] sm:$0xf]  ;;  %v269_v53 = vor.u32 %v311_v45, %v266_v46  ;;  %v306_v54 = vld [vmem:[%s480_s0 + $0x4] sm:$0xf]  ;;  %v242_v55 = vld [vmem:[%s480_s0 + $0x10] sm:$0xf0] }
   0xc   :  { %177 = vmatpush.bf16.msra.mxu2 %v297_v27  ;;  %190 = vmatpush.bf16.msra.mxu3 %v301_v28  ;;  %v248_v56 = vld [vmem:[%s480_s0 + $0x8] sm:$0xf]  ;;  %v309_v57 = vld [vmem:[%s480_s0 + $0x14] sm:$0xf0]  ;;  %v307_v58 = vld [vmem:[%s480_s0 + $0xc] sm:$0xf]  ;;  %v241_v60 = vor.u32 %v308_v51, %v240_v50  ;;  %v245_v61 = vor.u32 %v306_v54, %v242_v55 }
   0xd   :  { %37 = vperm.xlu0 %323, %v34_v47   ;;  %v250_v59 = vld [vmem:[%s480_s0 + $0x18] sm:$0xf0]  ;;  %v249_v62 = vor.u32 %v309_v57, %v248_v56  ;;  %v33_v0 = vld [vmem:[%s482_s1] sm:$0x3]  ;;  %vm219_vm4 = vcmask 1043458   ;;  %vm210_vm8 = vcmask 1045508  }
   0xe   :  { %v253_v63 = vor.u32 %v307_v58, %v250_v59  ;;  %vm220_vm5 = vsmask.f32 3328  ;;  %vm224_vm9 = vsmask.f32 5376  ;;  %vm227_vm12 = vcmask 1047558   ;;  %v231_v19 = vld [vmem:[%s483_s3] sm:$0xff] }
   0xf   :  { %152 = vmatpush.bf16.msra.mxu0 %v273_v35  ;;  %165 = vmatpush.bf16.msra.mxu1 %v277_v36  ;;  %vm462_vm7 = vmand %vm219_vm4, %vm220_vm5  ;;  %vm228_vm13 = vsmask.f32 7424 }
  0x10   :  { %178 = vmatpush.bf16.msra.mxu2 %v281_v40  ;;  %191 = vmatpush.bf16.msra.mxu3 %v285_v41  ;;  %vm222_vm10 = vmor %vm462_vm7, %vm458_vm6 }
  0x11   :  { %vm225_vm11 = vmand %vm210_vm8, %vm224_vm9 }
  0x12   :  { %vm226_vm14 = vmor %vm225_vm11, %vm222_vm10 }
  0x13   :  { %153 = vmatpush.bf16.msra.mxu0 %v257_v48  ;;  %166 = vmatpush.bf16.msra.mxu1 %v261_v49  ;;  %vm229_vm15 = vmand %vm227_vm12, %vm228_vm13 }
  0x14   :  { %179 = vmatpush.bf16.msra.mxu2 %v265_v52  ;;  %192 = vmatpush.bf16.msra.mxu3 %v269_v53 }
  0x17   :  { %154 = vmatpush.bf16.msra.mxu0 %v241_v60  ;;  %167 = vmatpush.bf16.msra.mxu1 %v245_v61 }
  0x18   :  { %180 = vmatpush.bf16.msra.mxu2 %v249_v62  ;;  %193 = vmatpush.bf16.msra.mxu3 %v253_v63 }
  0x1a   :  { %302 = vmatmul.msk.bf16.vlgmr.msra.gmra.mxu0 %vm130_vm1, %v33_v0  ;;  %303 = vmatmul.msk.bf16.vlgmr.msra.gmra.mxu1 %vm130_vm1, %v33_v0 }
  0x1b   :  { %304 = vmatmul.msk.bf16.vlgmr.msra.gmra.mxu2 %vm130_vm1, %v33_v0  ;;  %305 = vmatmul.msk.bf16.vlgmr.msra.gmra.mxu3 %vm130_vm1, %v33_v0  ;;  %vm230_vm1 = vmor %vm229_vm15, %vm226_vm14 }
  0x7f   :  { %v38_v1 = vpop.permute.xlu0 %37 }
  0x97   :  { %v156_v2 = vpop.f32.mrf.mxu0  ;;  %v169_v3 = vpop.f32.mrf.mxu1 }
  0x98   :  { %v157_v5 = vadd.f32 %v156_v2, %v38_v1  ;;  %v170_v6 = vadd.f32 %v169_v3, %v38_v1 }
  0x9a   :  { %v199_v8 = vpack.c.bf16 %v170_v6, %v157_v5 }
  0x9c   :  { %v203_v15 = vrot.slane %v199_v8, 2 }
  0x9e   :  { %v182_v9 = vpop.f32.mrf.mxu2  ;;  %v195_v10 = vpop.f32.mrf.mxu3  ;;  %v209_v20 = vsel %vm206_vm2, %v199_v8, %v203_v15 }
  0x9f   :  { %v183_v11 = vadd.f32 %v182_v9, %v38_v1  ;;  %v196_v12 = vadd.f32 %v195_v10, %v38_v1  ;;  %v158_v13 = vpop.f32.mrf.mxu0  ;;  %v171_v14 = vpop.f32.mrf.mxu1 }
  0xa1   :  { %v200_v16 = vpack.c.bf16 %v196_v12, %v183_v11 }
  0xa3   :  { %v204_v17 = vrot.slane %v200_v16, 4  ;;  %v205_v18 = vrot.slane %v200_v16, 6 }
  0xa5   :  { %v213_v21 = vsel %vm210_vm8, %v204_v17, %v205_v18 }
  0xa6   :  { %v214_v22 = vsel %vm134_vm0, %v209_v20, %v213_v21  ;;  %v184_v23 = vpop.f32.mrf.mxu2  ;;  %v197_v24 = vpop.f32.mrf.mxu3 }
  0xa7   :  { %v232_v25 = vsel %vm230_vm1, %v214_v22, %v231_v19 }
  0xa8   :  { %233 = vst [vmem:[%s483_s3] sm:$0xff] %v232_v25 }

</bundles_post_ra>
